<compile_context>
chip_gen: v7x
topology: tpu7x:2x2x1
jax: 0.10.0
libtpu: 0.0.40
codegen_flags: <defaults>
</compile_context>

<pallas_src>
import functools
import math

import jax
import jax.numpy as jnp
from jax.experimental import pallas as pl
from jax.experimental.pallas import tpu as pltpu


def _token_embedding_gather_kernel(tok_ref, emb_hbm, out_ref, buf, sem, *,
                                   tile_m, scale):
    # tok_ref: (n_pad,) int32 in SMEM (scalar prefetch)
    # emb_hbm: (V, E) table ref left in HBM (memory_space=pl.ANY)
    # out_ref: (tile_m, E) VMEM output block
    # buf:     (tile_m, E) VMEM gather buffer (scratch)
    # sem:     (tile_m,)   DMA semaphores     (scratch)
    i = pl.program_id(0)
    base = i * tile_m

    # Issue all row DMAs for this tile (static unroll; tile_m is small/static).
    for r in range(tile_m):
        tok = tok_ref[base + r]
        pltpu.make_async_copy(
            emb_hbm.at[pl.ds(tok, 1), :],
            buf.at[pl.ds(r, 1), :],
            sem.at[r],
        ).start()

    # Wait for all rows (source index is irrelevant for the wait descriptor).
    for r in range(tile_m):
        pltpu.make_async_copy(
            emb_hbm.at[pl.ds(0, 1), :],
            buf.at[pl.ds(r, 1), :],
            sem.at[r],
        ).wait()

    # Single VPU pass: scale on the way out of the gather buffer.
    out_ref[...] = (buf[...] * scale).astype(out_ref.dtype)


def token_embedding(tokens, emb_table, *, tile_m=128):
    """tokens: int [batch, seq]; emb_table: [vocab, emb]; returns [batch, seq, emb]."""
    batch, seq = tokens.shape
    vocab, emb = emb_table.shape
    n = batch * seq
    scale = math.sqrt(emb)

    # Clamp requested tile to the (8-rounded) problem size, keep multiple of 8.
    n8 = ((n + 7) // 8) * 8
    tile_m = max(8, min(((tile_m + 7) // 8) * 8, n8))
    n_pad = ((n + tile_m - 1) // tile_m) * tile_m
    grid = n_pad // tile_m

    tok_flat = tokens.reshape(n).astype(jnp.int32)
    # Defensive clamp: keeps every gather DMA in-bounds (see contract above).
    tok_flat = jnp.clip(tok_flat, 0, vocab - 1)
    if n_pad != n:
        tok_flat = jnp.pad(tok_flat, (0, n_pad - n))  # padded rows gather row 0, sliced off below

    kernel = functools.partial(_token_embedding_gather_kernel,
                               tile_m=tile_m, scale=scale)

    out_flat = pl.pallas_call(
        kernel,
        out_shape=jax.ShapeDtypeStruct((n_pad, emb), emb_table.dtype),
        grid_spec=pltpu.PrefetchScalarGridSpec(
            num_scalar_prefetch=1,               # token ids -> SMEM, visible to index_maps
            grid=(grid,),
            in_specs=[
                pl.BlockSpec(memory_space=pl.ANY),   # table stays in HBM; gathered by DMA
            ],
            out_specs=pl.BlockSpec((tile_m, emb), lambda i, tok: (i, 0)),
            scratch_shapes=[
                pltpu.VMEM((tile_m, emb), emb_table.dtype),
                pltpu.SemaphoreType.DMA((tile_m,)),
            ],
        ),
        compiler_params=pltpu.CompilerParams(
            dimension_semantics=("parallel",)),      # independent tiles; megacore-shardable
    )(tok_flat, emb_table)

    return out_flat[:n].reshape(batch, seq, emb)


if __name__ == "__main__":
    key = jax.random.PRNGKey(0)
    k_emb, k_tok = jax.random.split(key)

    vocab_size = 32
    emb_size = 128   # lane-dense output (multiple of 128)
    batch, seq = 2, 8

    # nn.Embedding default init: N(0, 1)
    emb_table = jax.random.normal(k_emb, (vocab_size, emb_size), dtype=jnp.float32)
    tokens = jax.random.randint(k_tok, (batch, seq), 0, vocab_size, dtype=jnp.int32)

    out = token_embedding(tokens, emb_table)
    out = jax.block_until_ready(out)

    # reference check: plain JAX gather * sqrt(emb_size)
    ref = emb_table[tokens] * math.sqrt(emb_size)
    assert out.shape == (batch, seq, emb_size)
    assert jnp.allclose(out, ref, atol=1e-5, rtol=1e-5)

    print("KERNEL_OK")
</pallas_src>

<mosaic_0001>
module attributes {stable_mosaic.version = 11 : i64} {
  func.func @_token_embedding_gather_kernel(%arg0: i32, %arg1: memref<16xi32, #tpu.memory_space<smem>>, %arg2: memref<32x128xf32, #tpu.memory_space<any>>, %arg3: memref<16x128xf32, #tpu.memory_space<vmem>>, %arg4: memref<16x128xf32, #tpu.memory_space<vmem>>, %arg5: memref<16x!tpu.dma_semaphore, #tpu.memory_space<semaphore_mem>>) attributes {dimension_semantics = [#tpu.dimension_semantics<parallel>], iteration_bounds = array<i64: 1>, scalar_prefetch = 1 : i64, scratch_operands = 2 : i64, tpu.core_type = #tpu.core_type<tc>, window_params = [{}, {transform_indices = @transform_1, window_bounds = array<i64: 16, 128>}]} {
    %c16_i32 = arith.constant 16 : i32
    %0 = arith.muli %arg0, %c16_i32 : i32
    %c0_i32 = arith.constant 0 : i32
    %1 = arith.addi %0, %c0_i32 : i32
    %2 = arith.index_cast %1 : i32 to index
    %3 = memref.load %arg1[%2] : memref<16xi32, #tpu.memory_space<smem>>
    %c0_i32_0 = arith.constant 0 : i32
    %c0_i32_1 = arith.constant 0 : i32
    %4 = tpu.memref_slice %arg2[%3, %c0_i32_1] : memref<32x128xf32, #tpu.memory_space<any>> -> memref<1x128xf32, #tpu.memory_space<any>>
    %c0_i32_2 = arith.constant 0 : i32
    %c0_i32_3 = arith.constant 0 : i32
    %5 = tpu.memref_slice %arg4[%c0_i32_2, %c0_i32_3] : memref<16x128xf32, #tpu.memory_space<vmem>> -> memref<1x128xf32, #tpu.memory_space<vmem>>
    %6 = tpu.memref_slice %arg5[%c0_i32_0] : memref<16x!tpu.dma_semaphore, #tpu.memory_space<semaphore_mem>> -> memref<1x!tpu.dma_semaphore, #tpu.memory_space<semaphore_mem>>
    %7 = tpu.memref_squeeze %6 : memref<1x!tpu.dma_semaphore, #tpu.memory_space<semaphore_mem>> -> memref<!tpu.dma_semaphore, #tpu.memory_space<semaphore_mem>>
    tpu.enqueue_dma source(%4 : memref<1x128xf32, #tpu.memory_space<any>>) target(%5 : memref<1x128xf32, #tpu.memory_space<vmem>>) target_semaphore(%7 : memref<!tpu.dma_semaphore, #tpu.memory_space<semaphore_mem>>)
    %c1_i32 = arith.constant 1 : i32
    %8 = arith.addi %0, %c1_i32 : i32
    %9 = arith.index_cast %8 : i32 to index
    %10 = memref.load %arg1[%9] : memref<16xi32, #tpu.memory_space<smem>>
    %c1_i32_4 = arith.constant 1 : i32
    %c0_i32_5 = arith.constant 0 : i32
    %11 = tpu.memref_slice %arg2[%10, %c0_i32_5] : memref<32x128xf32, #tpu.memory_space<any>> -> memref<1x128xf32, #tpu.memory_space<any>>
    %c1_i32_6 = arith.constant 1 : i32
    %c0_i32_7 = arith.constant 0 : i32
    %12 = tpu.memref_slice %arg4[%c1_i32_6, %c0_i32_7] : memref<16x128xf32, #tpu.memory_space<vmem>> -> memref<1x128xf32, #tpu.memory_space<vmem>>
    %13 = tpu.memref_slice %arg5[%c1_i32_4] : memref<16x!tpu.dma_semaphore, #tpu.memory_space<semaphore_mem>> -> memref<1x!tpu.dma_semaphore, #tpu.memory_space<semaphore_mem>>
    %14 = tpu.memref_squeeze %13 : memref<1x!tpu.dma_semaphore, #tpu.memory_space<semaphore_mem>> -> memref<!tpu.dma_semaphore, #tpu.memory_space<semaphore_mem>>
    tpu.enqueue_dma source(%11 : memref<1x128xf32, #tpu.memory_space<any>>) target(%12 : memref<1x128xf32, #tpu.memory_space<vmem>>) target_semaphore(%14 : memref<!tpu.dma_semaphore, #tpu.memory_space<semaphore_mem>>)
    %c2_i32 = arith.constant 2 : i32
    %15 = arith.addi %0, %c2_i32 : i32
    %16 = arith.index_cast %15 : i32 to index
    %17 = memref.load %arg1[%16] : memref<16xi32, #tpu.memory_space<smem>>
    %c2_i32_8 = arith.constant 2 : i32
    %c0_i32_9 = arith.constant 0 : i32
    %18 = tpu.memref_slice %arg2[%17, %c0_i32_9] : memref<32x128xf32, #tpu.memory_space<any>> -> memref<1x128xf32, #tpu.memory_space<any>>
    %c2_i32_10 = arith.constant 2 : i32
    %c0_i32_11 = arith.constant 0 : i32
    %19 = tpu.memref_slice %arg4[%c2_i32_10, %c0_i32_11] : memref<16x128xf32, #tpu.memory_space<vmem>> -> memref<1x128xf32, #tpu.memory_space<vmem>>
    %20 = tpu.memref_slice %arg5[%c2_i32_8] : memref<16x!tpu.dma_semaphore, #tpu.memory_space<semaphore_mem>> -> memref<1x!tpu.dma_semaphore, #tpu.memory_space<semaphore_mem>>
    %21 = tpu.memref_squeeze %20 : memref<1x!tpu.dma_semaphore, #tpu.memory_space<semaphore_mem>> -> memref<!tpu.dma_semaphore, #tpu.memory_space<semaphore_mem>>
    tpu.enqueue_dma source(%18 : memref<1x128xf32, #tpu.memory_space<any>>) target(%19 : memref<1x128xf32, #tpu.memory_space<vmem>>) target_semaphore(%21 : memref<!tpu.dma_semaphore, #tpu.memory_space<semaphore_mem>>)
    %c3_i32 = arith.constant 3 : i32
    %22 = arith.addi %0, %c3_i32 : i32
    %23 = arith.index_cast %22 : i32 to index
    %24 = memref.load %arg1[%23] : memref<16xi32, #tpu.memory_space<smem>>
    %c3_i32_12 = arith.constant 3 : i32
    %c0_i32_13 = arith.constant 0 : i32
    %25 = tpu.memref_slice %arg2[%24, %c0_i32_13] : memref<32x128xf32, #tpu.memory_space<any>> -> memref<1x128xf32, #tpu.memory_space<any>>
    %c3_i32_14 = arith.constant 3 : i32
    %c0_i32_15 = arith.constant 0 : i32
    %26 = tpu.memref_slice %arg4[%c3_i32_14, %c0_i32_15] : memref<16x128xf32, #tpu.memory_space<vmem>> -> memref<1x128xf32, #tpu.memory_space<vmem>>
    %27 = tpu.memref_slice %arg5[%c3_i32_12] : memref<16x!tpu.dma_semaphore, #tpu.memory_space<semaphore_mem>> -> memref<1x!tpu.dma_semaphore, #tpu.memory_space<semaphore_mem>>
    %28 = tpu.memref_squeeze %27 : memref<1x!tpu.dma_semaphore, #tpu.memory_space<semaphore_mem>> -> memref<!tpu.dma_semaphore, #tpu.memory_space<semaphore_mem>>
    tpu.enqueue_dma source(%25 : memref<1x128xf32, #tpu.memory_space<any>>) target(%26 : memref<1x128xf32, #tpu.memory_space<vmem>>) target_semaphore(%28 : memref<!tpu.dma_semaphore, #tpu.memory_space<semaphore_mem>>)
    %c4_i32 = arith.constant 4 : i32
    %29 = arith.addi %0, %c4_i32 : i32
    %30 = arith.index_cast %29 : i32 to index
    %31 = memref.load %arg1[%30] : memref<16xi32, #tpu.memory_space<smem>>
    %c4_i32_16 = arith.constant 4 : i32
    %c0_i32_17 = arith.constant 0 : i32
    %32 = tpu.memref_slice %arg2[%31, %c0_i32_17] : memref<32x128xf32, #tpu.memory_space<any>> -> memref<1x128xf32, #tpu.memory_space<any>>
    %c4_i32_18 = arith.constant 4 : i32
    %c0_i32_19 = arith.constant 0 : i32
    %33 = tpu.memref_slice %arg4[%c4_i32_18, %c0_i32_19] : memref<16x128xf32, #tpu.memory_space<vmem>> -> memref<1x128xf32, #tpu.memory_space<vmem>>
    %34 = tpu.memref_slice %arg5[%c4_i32_16] : memref<16x!tpu.dma_semaphore, #tpu.memory_space<semaphore_mem>> -> memref<1x!tpu.dma_semaphore, #tpu.memory_space<semaphore_mem>>
    %35 = tpu.memref_squeeze %34 : memref<1x!tpu.dma_semaphore, #tpu.memory_space<semaphore_mem>> -> memref<!tpu.dma_semaphore, #tpu.memory_space<semaphore_mem>>
    tpu.enqueue_dma source(%32 : memref<1x128xf32, #tpu.memory_space<any>>) target(%33 : memref<1x128xf32, #tpu.memory_space<vmem>>) target_semaphore(%35 : memref<!tpu.dma_semaphore, #tpu.memory_space<semaphore_mem>>)
    %c5_i32 = arith.constant 5 : i32
    %36 = arith.addi %0, %c5_i32 : i32
    %37 = arith.index_cast %36 : i32 to index
    %38 = memref.load %arg1[%37] : memref<16xi32, #tpu.memory_space<smem>>
    %c5_i32_20 = arith.constant 5 : i32
    %c0_i32_21 = arith.constant 0 : i32
    %39 = tpu.memref_slice %arg2[%38, %c0_i32_21] : memref<32x128xf32, #tpu.memory_space<any>> -> memref<1x128xf32, #tpu.memory_space<any>>
    %c5_i32_22 = arith.constant 5 : i32
    %c0_i32_23 = arith.constant 0 : i32
    %40 = tpu.memref_slice %arg4[%c5_i32_22, %c0_i32_23] : memref<16x128xf32, #tpu.memory_space<vmem>> -> memref<1x128xf32, #tpu.memory_space<vmem>>
    %41 = tpu.memref_slice %arg5[%c5_i32_20] : memref<16x!tpu.dma_semaphore, #tpu.memory_space<semaphore_mem>> -> memref<1x!tpu.dma_semaphore, #tpu.memory_space<semaphore_mem>>
    %42 = tpu.memref_squeeze %41 : memref<1x!tpu.dma_semaphore, #tpu.memory_space<semaphore_mem>> -> memref<!tpu.dma_semaphore, #tpu.memory_space<semaphore_mem>>
    tpu.enqueue_dma source(%39 : memref<1x128xf32, #tpu.memory_space<any>>) target(%40 : memref<1x128xf32, #tpu.memory_space<vmem>>) target_semaphore(%42 : memref<!tpu.dma_semaphore, #tpu.memory_space<semaphore_mem>>)
    %c6_i32 = arith.constant 6 : i32
    %43 = arith.addi %0, %c6_i32 : i32
    %44 = arith.index_cast %43 : i32 to index
    %45 = memref.load %arg1[%44] : memref<16xi32, #tpu.memory_space<smem>>
    %c6_i32_24 = arith.constant 6 : i32
    %c0_i32_25 = arith.constant 0 : i32
    %46 = tpu.memref_slice %arg2[%45, %c0_i32_25] : memref<32x128xf32, #tpu.memory_space<any>> -> memref<1x128xf32, #tpu.memory_space<any>>
    %c6_i32_26 = arith.constant 6 : i32
    %c0_i32_27 = arith.constant 0 : i32
    %47 = tpu.memref_slice %arg4[%c6_i32_26, %c0_i32_27] : memref<16x128xf32, #tpu.memory_space<vmem>> -> memref<1x128xf32, #tpu.memory_space<vmem>>
    %48 = tpu.memref_slice %arg5[%c6_i32_24] : memref<16x!tpu.dma_semaphore, #tpu.memory_space<semaphore_mem>> -> memref<1x!tpu.dma_semaphore, #tpu.memory_space<semaphore_mem>>
    %49 = tpu.memref_squeeze %48 : memref<1x!tpu.dma_semaphore, #tpu.memory_space<semaphore_mem>> -> memref<!tpu.dma_semaphore, #tpu.memory_space<semaphore_mem>>
    tpu.enqueue_dma source(%46 : memref<1x128xf32, #tpu.memory_space<any>>) target(%47 : memref<1x128xf32, #tpu.memory_space<vmem>>) target_semaphore(%49 : memref<!tpu.dma_semaphore, #tpu.memory_space<semaphore_mem>>)
    %c7_i32 = arith.constant 7 : i32
    %50 = arith.addi %0, %c7_i32 : i32
    %51 = arith.index_cast %50 : i32 to index
    %52 = memref.load %arg1[%51] : memref<16xi32, #tpu.memory_space<smem>>
    %c7_i32_28 = arith.constant 7 : i32
    %c0_i32_29 = arith.constant 0 : i32
    %53 = tpu.memref_slice %arg2[%52, %c0_i32_29] : memref<32x128xf32, #tpu.memory_space<any>> -> memref<1x128xf32, #tpu.memory_space<any>>
    %c7_i32_30 = arith.constant 7 : i32
    %c0_i32_31 = arith.constant 0 : i32
    %54 = tpu.memref_slice %arg4[%c7_i32_30, %c0_i32_31] : memref<16x128xf32, #tpu.memory_space<vmem>> -> memref<1x128xf32, #tpu.memory_space<vmem>>
    %55 = tpu.memref_slice %arg5[%c7_i32_28] : memref<16x!tpu.dma_semaphore, #tpu.memory_space<semaphore_mem>> -> memref<1x!tpu.dma_semaphore, #tpu.memory_space<semaphore_mem>>
    %56 = tpu.memref_squeeze %55 : memref<1x!tpu.dma_semaphore, #tpu.memory_space<semaphore_mem>> -> memref<!tpu.dma_semaphore, #tpu.memory_space<semaphore_mem>>
    tpu.enqueue_dma source(%53 : memref<1x128xf32, #tpu.memory_space<any>>) target(%54 : memref<1x128xf32, #tpu.memory_space<vmem>>) target_semaphore(%56 : memref<!tpu.dma_semaphore, #tpu.memory_space<semaphore_mem>>)
    %c8_i32 = arith.constant 8 : i32
    %57 = arith.addi %0, %c8_i32 : i32
    %58 = arith.index_cast %57 : i32 to index
    %59 = memref.load %arg1[%58] : memref<16xi32, #tpu.memory_space<smem>>
    %c8_i32_32 = arith.constant 8 : i32
    %c0_i32_33 = arith.constant 0 : i32
    %60 = tpu.memref_slice %arg2[%59, %c0_i32_33] : memref<32x128xf32, #tpu.memory_space<any>> -> memref<1x128xf32, #tpu.memory_space<any>>
    %c8_i32_34 = arith.constant 8 : i32
    %c0_i32_35 = arith.constant 0 : i32
    %61 = tpu.memref_slice %arg4[%c8_i32_34, %c0_i32_35] : memref<16x128xf32, #tpu.memory_space<vmem>> -> memref<1x128xf32, #tpu.memory_space<vmem>>
    %62 = tpu.memref_slice %arg5[%c8_i32_32] : memref<16x!tpu.dma_semaphore, #tpu.memory_space<semaphore_mem>> -> memref<1x!tpu.dma_semaphore, #tpu.memory_space<semaphore_mem>>
    %63 = tpu.memref_squeeze %62 : memref<1x!tpu.dma_semaphore, #tpu.memory_space<semaphore_mem>> -> memref<!tpu.dma_semaphore, #tpu.memory_space<semaphore_mem>>
    tpu.enqueue_dma source(%60 : memref<1x128xf32, #tpu.memory_space<any>>) target(%61 : memref<1x128xf32, #tpu.memory_space<vmem>>) target_semaphore(%63 : memref<!tpu.dma_semaphore, #tpu.memory_space<semaphore_mem>>)
    %c9_i32 = arith.constant 9 : i32
    %64 = arith.addi %0, %c9_i32 : i32
    %65 = arith.index_cast %64 : i32 to index
    %66 = memref.load %arg1[%65] : memref<16xi32, #tpu.memory_space<smem>>
    %c9_i32_36 = arith.constant 9 : i32
    %c0_i32_37 = arith.constant 0 : i32
    %67 = tpu.memref_slice %arg2[%66, %c0_i32_37] : memref<32x128xf32, #tpu.memory_space<any>> -> memref<1x128xf32, #tpu.memory_space<any>>
    %c9_i32_38 = arith.constant 9 : i32
    %c0_i32_39 = arith.constant 0 : i32
    %68 = tpu.memref_slice %arg4[%c9_i32_38, %c0_i32_39] : memref<16x128xf32, #tpu.memory_space<vmem>> -> memref<1x128xf32, #tpu.memory_space<vmem>>
    %69 = tpu.memref_slice %arg5[%c9_i32_36] : memref<16x!tpu.dma_semaphore, #tpu.memory_space<semaphore_mem>> -> memref<1x!tpu.dma_semaphore, #tpu.memory_space<semaphore_mem>>
    %70 = tpu.memref_squeeze %69 : memref<1x!tpu.dma_semaphore, #tpu.memory_space<semaphore_mem>> -> memref<!tpu.dma_semaphore, #tpu.memory_space<semaphore_mem>>
    tpu.enqueue_dma source(%67 : memref<1x128xf32, #tpu.memory_space<any>>) target(%68 : memref<1x128xf32, #tpu.memory_space<vmem>>) target_semaphore(%70 : memref<!tpu.dma_semaphore, #tpu.memory_space<semaphore_mem>>)
    %c10_i32 = arith.constant 10 : i32
    %71 = arith.addi %0, %c10_i32 : i32
    %72 = arith.index_cast %71 : i32 to index
    %73 = memref.load %arg1[%72] : memref<16xi32, #tpu.memory_space<smem>>
    %c10_i32_40 = arith.constant 10 : i32
    %c0_i32_41 = arith.constant 0 : i32
    %74 = tpu.memref_slice %arg2[%73, %c0_i32_41] : memref<32x128xf32, #tpu.memory_space<any>> -> memref<1x128xf32, #tpu.memory_space<any>>
    %c10_i32_42 = arith.constant 10 : i32
    %c0_i32_43 = arith.constant 0 : i32
    %75 = tpu.memref_slice %arg4[%c10_i32_42, %c0_i32_43] : memref<16x128xf32, #tpu.memory_space<vmem>> -> memref<1x128xf32, #tpu.memory_space<vmem>>
    %76 = tpu.memref_slice %arg5[%c10_i32_40] : memref<16x!tpu.dma_semaphore, #tpu.memory_space<semaphore_mem>> -> memref<1x!tpu.dma_semaphore, #tpu.memory_space<semaphore_mem>>
    %77 = tpu.memref_squeeze %76 : memref<1x!tpu.dma_semaphore, #tpu.memory_space<semaphore_mem>> -> memref<!tpu.dma_semaphore, #tpu.memory_space<semaphore_mem>>
    tpu.enqueue_dma source(%74 : memref<1x128xf32, #tpu.memory_space<any>>) target(%75 : memref<1x128xf32, #tpu.memory_space<vmem>>) target_semaphore(%77 : memref<!tpu.dma_semaphore, #tpu.memory_space<semaphore_mem>>)
    %c11_i32 = arith.constant 11 : i32
    %78 = arith.addi %0, %c11_i32 : i32
    %79 = arith.index_cast %78 : i32 to index
    %80 = memref.load %arg1[%79] : memref<16xi32, #tpu.memory_space<smem>>
    %c11_i32_44 = arith.constant 11 : i32
    %c0_i32_45 = arith.constant 0 : i32
    %81 = tpu.memref_slice %arg2[%80, %c0_i32_45] : memref<32x128xf32, #tpu.memory_space<any>> -> memref<1x128xf32, #tpu.memory_space<any>>
    %c11_i32_46 = arith.constant 11 : i32
    %c0_i32_47 = arith.constant 0 : i32
    %82 = tpu.memref_slice %arg4[%c11_i32_46, %c0_i32_47] : memref<16x128xf32, #tpu.memory_space<vmem>> -> memref<1x128xf32, #tpu.memory_space<vmem>>
    %83 = tpu.memref_slice %arg5[%c11_i32_44] : memref<16x!tpu.dma_semaphore, #tpu.memory_space<semaphore_mem>> -> memref<1x!tpu.dma_semaphore, #tpu.memory_space<semaphore_mem>>
    %84 = tpu.memref_squeeze %83 : memref<1x!tpu.dma_semaphore, #tpu.memory_space<semaphore_mem>> -> memref<!tpu.dma_semaphore, #tpu.memory_space<semaphore_mem>>
    tpu.enqueue_dma source(%81 : memref<1x128xf32, #tpu.memory_space<any>>) target(%82 : memref<1x128xf32, #tpu.memory_space<vmem>>) target_semaphore(%84 : memref<!tpu.dma_semaphore, #tpu.memory_space<semaphore_mem>>)
    %c12_i32 = arith.constant 12 : i32
    %85 = arith.addi %0, %c12_i32 : i32
    %86 = arith.index_cast %85 : i32 to index
    %87 = memref.load %arg1[%86] : memref<16xi32, #tpu.memory_space<smem>>
    %c12_i32_48 = arith.constant 12 : i32
    %c0_i32_49 = arith.constant 0 : i32
    %88 = tpu.memref_slice %arg2[%87, %c0_i32_49] : memref<32x128xf32, #tpu.memory_space<any>> -> memref<1x128xf32, #tpu.memory_space<any>>
    %c12_i32_50 = arith.constant 12 : i32
    %c0_i32_51 = arith.constant 0 : i32
    %89 = tpu.memref_slice %arg4[%c12_i32_50, %c0_i32_51] : memref<16x128xf32, #tpu.memory_space<vmem>> -> memref<1x128xf32, #tpu.memory_space<vmem>>
    %90 = tpu.memref_slice %arg5[%c12_i32_48] : memref<16x!tpu.dma_semaphore, #tpu.memory_space<semaphore_mem>> -> memref<1x!tpu.dma_semaphore, #tpu.memory_space<semaphore_mem>>
    %91 = tpu.memref_squeeze %90 : memref<1x!tpu.dma_semaphore, #tpu.memory_space<semaphore_mem>> -> memref<!tpu.dma_semaphore, #tpu.memory_space<semaphore_mem>>
    tpu.enqueue_dma source(%88 : memref<1x128xf32, #tpu.memory_space<any>>) target(%89 : memref<1x128xf32, #tpu.memory_space<vmem>>) target_semaphore(%91 : memref<!tpu.dma_semaphore, #tpu.memory_space<semaphore_mem>>)
    %c13_i32 = arith.constant 13 : i32
    %92 = arith.addi %0, %c13_i32 : i32
    %93 = arith.index_cast %92 : i32 to index
    %94 = memref.load %arg1[%93] : memref<16xi32, #tpu.memory_space<smem>>
    %c13_i32_52 = arith.constant 13 : i32
    %c0_i32_53 = arith.constant 0 : i32
    %95 = tpu.memref_slice %arg2[%94, %c0_i32_53] : memref<32x128xf32, #tpu.memory_space<any>> -> memref<1x128xf32, #tpu.memory_space<any>>
    %c13_i32_54 = arith.constant 13 : i32
    %c0_i32_55 = arith.constant 0 : i32
    %96 = tpu.memref_slice %arg4[%c13_i32_54, %c0_i32_55] : memref<16x128xf32, #tpu.memory_space<vmem>> -> memref<1x128xf32, #tpu.memory_space<vmem>>
    %97 = tpu.memref_slice %arg5[%c13_i32_52] : memref<16x!tpu.dma_semaphore, #tpu.memory_space<semaphore_mem>> -> memref<1x!tpu.dma_semaphore, #tpu.memory_space<semaphore_mem>>
    %98 = tpu.memref_squeeze %97 : memref<1x!tpu.dma_semaphore, #tpu.memory_space<semaphore_mem>> -> memref<!tpu.dma_semaphore, #tpu.memory_space<semaphore_mem>>
    tpu.enqueue_dma source(%95 : memref<1x128xf32, #tpu.memory_space<any>>) target(%96 : memref<1x128xf32, #tpu.memory_space<vmem>>) target_semaphore(%98 : memref<!tpu.dma_semaphore, #tpu.memory_space<semaphore_mem>>)
    %c14_i32 = arith.constant 14 : i32
    %99 = arith.addi %0, %c14_i32 : i32
    %100 = arith.index_cast %99 : i32 to index
    %101 = memref.load %arg1[%100] : memref<16xi32, #tpu.memory_space<smem>>
    %c14_i32_56 = arith.constant 14 : i32
    %c0_i32_57 = arith.constant 0 : i32
    %102 = tpu.memref_slice %arg2[%101, %c0_i32_57] : memref<32x128xf32, #tpu.memory_space<any>> -> memref<1x128xf32, #tpu.memory_space<any>>
    %c14_i32_58 = arith.constant 14 : i32
    %c0_i32_59 = arith.constant 0 : i32
    %103 = tpu.memref_slice %arg4[%c14_i32_58, %c0_i32_59] : memref<16x128xf32, #tpu.memory_space<vmem>> -> memref<1x128xf32, #tpu.memory_space<vmem>>
    %104 = tpu.memref_slice %arg5[%c14_i32_56] : memref<16x!tpu.dma_semaphore, #tpu.memory_space<semaphore_mem>> -> memref<1x!tpu.dma_semaphore, #tpu.memory_space<semaphore_mem>>
    %105 = tpu.memref_squeeze %104 : memref<1x!tpu.dma_semaphore, #tpu.memory_space<semaphore_mem>> -> memref<!tpu.dma_semaphore, #tpu.memory_space<semaphore_mem>>
    tpu.enqueue_dma source(%102 : memref<1x128xf32, #tpu.memory_space<any>>) target(%103 : memref<1x128xf32, #tpu.memory_space<vmem>>) target_semaphore(%105 : memref<!tpu.dma_semaphore, #tpu.memory_space<semaphore_mem>>)
    %c15_i32 = arith.constant 15 : i32
    %106 = arith.addi %0, %c15_i32 : i32
    %107 = arith.index_cast %106 : i32 to index
    %108 = memref.load %arg1[%107] : memref<16xi32, #tpu.memory_space<smem>>
    %c15_i32_60 = arith.constant 15 : i32
    %c0_i32_61 = arith.constant 0 : i32
    %109 = tpu.memref_slice %arg2[%108, %c0_i32_61] : memref<32x128xf32, #tpu.memory_space<any>> -> memref<1x128xf32, #tpu.memory_space<any>>
    %c15_i32_62 = arith.constant 15 : i32
    %c0_i32_63 = arith.constant 0 : i32
    %110 = tpu.memref_slice %arg4[%c15_i32_62, %c0_i32_63] : memref<16x128xf32, #tpu.memory_space<vmem>> -> memref<1x128xf32, #tpu.memory_space<vmem>>
    %111 = tpu.memref_slice %arg5[%c15_i32_60] : memref<16x!tpu.dma_semaphore, #tpu.memory_space<semaphore_mem>> -> memref<1x!tpu.dma_semaphore, #tpu.memory_space<semaphore_mem>>
    %112 = tpu.memref_squeeze %111 : memref<1x!tpu.dma_semaphore, #tpu.memory_space<semaphore_mem>> -> memref<!tpu.dma_semaphore, #tpu.memory_space<semaphore_mem>>
    tpu.enqueue_dma source(%109 : memref<1x128xf32, #tpu.memory_space<any>>) target(%110 : memref<1x128xf32, #tpu.memory_space<vmem>>) target_semaphore(%112 : memref<!tpu.dma_semaphore, #tpu.memory_space<semaphore_mem>>)
    %c0_i32_64 = arith.constant 0 : i32
    %c0_i32_65 = arith.constant 0 : i32
    %c0_i32_66 = arith.constant 0 : i32
    %113 = tpu.memref_slice %arg2[%c0_i32_65, %c0_i32_66] : memref<32x128xf32, #tpu.memory_space<any>> -> memref<1x128xf32, #tpu.memory_space<any>>
    %c0_i32_67 = arith.constant 0 : i32
    %c0_i32_68 = arith.constant 0 : i32
    %114 = tpu.memref_slice %arg4[%c0_i32_67, %c0_i32_68] : memref<16x128xf32, #tpu.memory_space<vmem>> -> memref<1x128xf32, #tpu.memory_space<vmem>>
    %115 = tpu.memref_slice %arg5[%c0_i32_64] : memref<16x!tpu.dma_semaphore, #tpu.memory_space<semaphore_mem>> -> memref<1x!tpu.dma_semaphore, #tpu.memory_space<semaphore_mem>>
    %116 = tpu.memref_squeeze %115 : memref<1x!tpu.dma_semaphore, #tpu.memory_space<semaphore_mem>> -> memref<!tpu.dma_semaphore, #tpu.memory_space<semaphore_mem>>
    tpu.wait_dma2 semaphore(%116 : memref<!tpu.dma_semaphore, #tpu.memory_space<semaphore_mem>>) src(%113 : memref<1x128xf32, #tpu.memory_space<any>>) dst(%114 : memref<1x128xf32, #tpu.memory_space<vmem>>)
    %c1_i32_69 = arith.constant 1 : i32
    %c0_i32_70 = arith.constant 0 : i32
    %c0_i32_71 = arith.constant 0 : i32
    %117 = tpu.memref_slice %arg2[%c0_i32_70, %c0_i32_71] : memref<32x128xf32, #tpu.memory_space<any>> -> memref<1x128xf32, #tpu.memory_space<any>>
    %c1_i32_72 = arith.constant 1 : i32
    %c0_i32_73 = arith.constant 0 : i32
    %118 = tpu.memref_slice %arg4[%c1_i32_72, %c0_i32_73] : memref<16x128xf32, #tpu.memory_space<vmem>> -> memref<1x128xf32, #tpu.memory_space<vmem>>
    %119 = tpu.memref_slice %arg5[%c1_i32_69] : memref<16x!tpu.dma_semaphore, #tpu.memory_space<semaphore_mem>> -> memref<1x!tpu.dma_semaphore, #tpu.memory_space<semaphore_mem>>
    %120 = tpu.memref_squeeze %119 : memref<1x!tpu.dma_semaphore, #tpu.memory_space<semaphore_mem>> -> memref<!tpu.dma_semaphore, #tpu.memory_space<semaphore_mem>>
    tpu.wait_dma2 semaphore(%120 : memref<!tpu.dma_semaphore, #tpu.memory_space<semaphore_mem>>) src(%117 : memref<1x128xf32, #tpu.memory_space<any>>) dst(%118 : memref<1x128xf32, #tpu.memory_space<vmem>>)
    %c2_i32_74 = arith.constant 2 : i32
    %c0_i32_75 = arith.constant 0 : i32
    %c0_i32_76 = arith.constant 0 : i32
    %121 = tpu.memref_slice %arg2[%c0_i32_75, %c0_i32_76] : memref<32x128xf32, #tpu.memory_space<any>> -> memref<1x128xf32, #tpu.memory_space<any>>
    %c2_i32_77 = arith.constant 2 : i32
    %c0_i32_78 = arith.constant 0 : i32
    %122 = tpu.memref_slice %arg4[%c2_i32_77, %c0_i32_78] : memref<16x128xf32, #tpu.memory_space<vmem>> -> memref<1x128xf32, #tpu.memory_space<vmem>>
    %123 = tpu.memref_slice %arg5[%c2_i32_74] : memref<16x!tpu.dma_semaphore, #tpu.memory_space<semaphore_mem>> -> memref<1x!tpu.dma_semaphore, #tpu.memory_space<semaphore_mem>>
    %124 = tpu.memref_squeeze %123 : memref<1x!tpu.dma_semaphore, #tpu.memory_space<semaphore_mem>> -> memref<!tpu.dma_semaphore, #tpu.memory_space<semaphore_mem>>
    tpu.wait_dma2 semaphore(%124 : memref<!tpu.dma_semaphore, #tpu.memory_space<semaphore_mem>>) src(%121 : memref<1x128xf32, #tpu.memory_space<any>>) dst(%122 : memref<1x128xf32, #tpu.memory_space<vmem>>)
    %c3_i32_79 = arith.constant 3 : i32
    %c0_i32_80 = arith.constant 0 : i32
    %c0_i32_81 = arith.constant 0 : i32
    %125 = tpu.memref_slice %arg2[%c0_i32_80, %c0_i32_81] : memref<32x128xf32, #tpu.memory_space<any>> -> memref<1x128xf32, #tpu.memory_space<any>>
    %c3_i32_82 = arith.constant 3 : i32
    %c0_i32_83 = arith.constant 0 : i32
    %126 = tpu.memref_slice %arg4[%c3_i32_82, %c0_i32_83] : memref<16x128xf32, #tpu.memory_space<vmem>> -> memref<1x128xf32, #tpu.memory_space<vmem>>
    %127 = tpu.memref_slice %arg5[%c3_i32_79] : memref<16x!tpu.dma_semaphore, #tpu.memory_space<semaphore_mem>> -> memref<1x!tpu.dma_semaphore, #tpu.memory_space<semaphore_mem>>
    %128 = tpu.memref_squeeze %127 : memref<1x!tpu.dma_semaphore, #tpu.memory_space<semaphore_mem>> -> memref<!tpu.dma_semaphore, #tpu.memory_space<semaphore_mem>>
    tpu.wait_dma2 semaphore(%128 : memref<!tpu.dma_semaphore, #tpu.memory_space<semaphore_mem>>) src(%125 : memref<1x128xf32, #tpu.memory_space<any>>) dst(%126 : memref<1x128xf32, #tpu.memory_space<vmem>>)
    %c4_i32_84 = arith.constant 4 : i32
    %c0_i32_85 = arith.constant 0 : i32
    %c0_i32_86 = arith.constant 0 : i32
    %129 = tpu.memref_slice %arg2[%c0_i32_85, %c0_i32_86] : memref<32x128xf32, #tpu.memory_space<any>> -> memref<1x128xf32, #tpu.memory_space<any>>
    %c4_i32_87 = arith.constant 4 : i32
    %c0_i32_88 = arith.constant 0 : i32
    %130 = tpu.memref_slice %arg4[%c4_i32_87, %c0_i32_88] : memref<16x128xf32, #tpu.memory_space<vmem>> -> memref<1x128xf32, #tpu.memory_space<vmem>>
    %131 = tpu.memref_slice %arg5[%c4_i32_84] : memref<16x!tpu.dma_semaphore, #tpu.memory_space<semaphore_mem>> -> memref<1x!tpu.dma_semaphore, #tpu.memory_space<semaphore_mem>>
    %132 = tpu.memref_squeeze %131 : memref<1x!tpu.dma_semaphore, #tpu.memory_space<semaphore_mem>> -> memref<!tpu.dma_semaphore, #tpu.memory_space<semaphore_mem>>
    tpu.wait_dma2 semaphore(%132 : memref<!tpu.dma_semaphore, #tpu.memory_space<semaphore_mem>>) src(%129 : memref<1x128xf32, #tpu.memory_space<any>>) dst(%130 : memref<1x128xf32, #tpu.memory_space<vmem>>)
    %c5_i32_89 = arith.constant 5 : i32
    %c0_i32_90 = arith.constant 0 : i32
    %c0_i32_91 = arith.constant 0 : i32
    %133 = tpu.memref_slice %arg2[%c0_i32_90, %c0_i32_91] : memref<32x128xf32, #tpu.memory_space<any>> -> memref<1x128xf32, #tpu.memory_space<any>>
    %c5_i32_92 = arith.constant 5 : i32
    %c0_i32_93 = arith.constant 0 : i32
    %134 = tpu.memref_slice %arg4[%c5_i32_92, %c0_i32_93] : memref<16x128xf32, #tpu.memory_space<vmem>> -> memref<1x128xf32, #tpu.memory_space<vmem>>
    %135 = tpu.memref_slice %arg5[%c5_i32_89] : memref<16x!tpu.dma_semaphore, #tpu.memory_space<semaphore_mem>> -> memref<1x!tpu.dma_semaphore, #tpu.memory_space<semaphore_mem>>
    %136 = tpu.memref_squeeze %135 : memref<1x!tpu.dma_semaphore, #tpu.memory_space<semaphore_mem>> -> memref<!tpu.dma_semaphore, #tpu.memory_space<semaphore_mem>>
    tpu.wait_dma2 semaphore(%136 : memref<!tpu.dma_semaphore, #tpu.memory_space<semaphore_mem>>) src(%133 : memref<1x128xf32, #tpu.memory_space<any>>) dst(%134 : memref<1x128xf32, #tpu.memory_space<vmem>>)
    %c6_i32_94 = arith.constant 6 : i32
    %c0_i32_95 = arith.constant 0 : i32
    %c0_i32_96 = arith.constant 0 : i32
    %137 = tpu.memref_slice %arg2[%c0_i32_95, %c0_i32_96] : memref<32x128xf32, #tpu.memory_space<any>> -> memref<1x128xf32, #tpu.memory_space<any>>
    %c6_i32_97 = arith.constant 6 : i32
    %c0_i32_98 = arith.constant 0 : i32
    %138 = tpu.memref_slice %arg4[%c6_i32_97, %c0_i32_98] : memref<16x128xf32, #tpu.memory_space<vmem>> -> memref<1x128xf32, #tpu.memory_space<vmem>>
    %139 = tpu.memref_slice %arg5[%c6_i32_94] : memref<16x!tpu.dma_semaphore, #tpu.memory_space<semaphore_mem>> -> memref<1x!tpu.dma_semaphore, #tpu.memory_space<semaphore_mem>>
    %140 = tpu.memref_squeeze %139 : memref<1x!tpu.dma_semaphore, #tpu.memory_space<semaphore_mem>> -> memref<!tpu.dma_semaphore, #tpu.memory_space<semaphore_mem>>
    tpu.wait_dma2 semaphore(%140 : memref<!tpu.dma_semaphore, #tpu.memory_space<semaphore_mem>>) src(%137 : memref<1x128xf32, #tpu.memory_space<any>>) dst(%138 : memref<1x128xf32, #tpu.memory_space<vmem>>)
    %c7_i32_99 = arith.constant 7 : i32
    %c0_i32_100 = arith.constant 0 : i32
    %c0_i32_101 = arith.constant 0 : i32
    %141 = tpu.memref_slice %arg2[%c0_i32_100, %c0_i32_101] : memref<32x128xf32, #tpu.memory_space<any>> -> memref<1x128xf32, #tpu.memory_space<any>>
    %c7_i32_102 = arith.constant 7 : i32
    %c0_i32_103 = arith.constant 0 : i32
    %142 = tpu.memref_slice %arg4[%c7_i32_102, %c0_i32_103] : memref<16x128xf32, #tpu.memory_space<vmem>> -> memref<1x128xf32, #tpu.memory_space<vmem>>
    %143 = tpu.memref_slice %arg5[%c7_i32_99] : memref<16x!tpu.dma_semaphore, #tpu.memory_space<semaphore_mem>> -> memref<1x!tpu.dma_semaphore, #tpu.memory_space<semaphore_mem>>
    %144 = tpu.memref_squeeze %143 : memref<1x!tpu.dma_semaphore, #tpu.memory_space<semaphore_mem>> -> memref<!tpu.dma_semaphore, #tpu.memory_space<semaphore_mem>>
    tpu.wait_dma2 semaphore(%144 : memref<!tpu.dma_semaphore, #tpu.memory_space<semaphore_mem>>) src(%141 : memref<1x128xf32, #tpu.memory_space<any>>) dst(%142 : memref<1x128xf32, #tpu.memory_space<vmem>>)
    %c8_i32_104 = arith.constant 8 : i32
    %c0_i32_105 = arith.constant 0 : i32
    %c0_i32_106 = arith.constant 0 : i32
    %145 = tpu.memref_slice %arg2[%c0_i32_105, %c0_i32_106] : memref<32x128xf32, #tpu.memory_space<any>> -> memref<1x128xf32, #tpu.memory_space<any>>
    %c8_i32_107 = arith.constant 8 : i32
    %c0_i32_108 = arith.constant 0 : i32
    %146 = tpu.memref_slice %arg4[%c8_i32_107, %c0_i32_108] : memref<16x128xf32, #tpu.memory_space<vmem>> -> memref<1x128xf32, #tpu.memory_space<vmem>>
    %147 = tpu.memref_slice %arg5[%c8_i32_104] : memref<16x!tpu.dma_semaphore, #tpu.memory_space<semaphore_mem>> -> memref<1x!tpu.dma_semaphore, #tpu.memory_space<semaphore_mem>>
    %148 = tpu.memref_squeeze %147 : memref<1x!tpu.dma_semaphore, #tpu.memory_space<semaphore_mem>> -> memref<!tpu.dma_semaphore, #tpu.memory_space<semaphore_mem>>
    tpu.wait_dma2 semaphore(%148 : memref<!tpu.dma_semaphore, #tpu.memory_space<semaphore_mem>>) src(%145 : memref<1x128xf32, #tpu.memory_space<any>>) dst(%146 : memref<1x128xf32, #tpu.memory_space<vmem>>)
    %c9_i32_109 = arith.constant 9 : i32
    %c0_i32_110 = arith.constant 0 : i32
    %c0_i32_111 = arith.constant 0 : i32
    %149 = tpu.memref_slice %arg2[%c0_i32_110, %c0_i32_111] : memref<32x128xf32, #tpu.memory_space<any>> -> memref<1x128xf32, #tpu.memory_space<any>>
    %c9_i32_112 = arith.constant 9 : i32
    %c0_i32_113 = arith.constant 0 : i32
    %150 = tpu.memref_slice %arg4[%c9_i32_112, %c0_i32_113] : memref<16x128xf32, #tpu.memory_space<vmem>> -> memref<1x128xf32, #tpu.memory_space<vmem>>
    %151 = tpu.memref_slice %arg5[%c9_i32_109] : memref<16x!tpu.dma_semaphore, #tpu.memory_space<semaphore_mem>> -> memref<1x!tpu.dma_semaphore, #tpu.memory_space<semaphore_mem>>
    %152 = tpu.memref_squeeze %151 : memref<1x!tpu.dma_semaphore, #tpu.memory_space<semaphore_mem>> -> memref<!tpu.dma_semaphore, #tpu.memory_space<semaphore_mem>>
    tpu.wait_dma2 semaphore(%152 : memref<!tpu.dma_semaphore, #tpu.memory_space<semaphore_mem>>) src(%149 : memref<1x128xf32, #tpu.memory_space<any>>) dst(%150 : memref<1x128xf32, #tpu.memory_space<vmem>>)
    %c10_i32_114 = arith.constant 10 : i32
    %c0_i32_115 = arith.constant 0 : i32
    %c0_i32_116 = arith.constant 0 : i32
    %153 = tpu.memref_slice %arg2[%c0_i32_115, %c0_i32_116] : memref<32x128xf32, #tpu.memory_space<any>> -> memref<1x128xf32, #tpu.memory_space<any>>
    %c10_i32_117 = arith.constant 10 : i32
    %c0_i32_118 = arith.constant 0 : i32
    %154 = tpu.memref_slice %arg4[%c10_i32_117, %c0_i32_118] : memref<16x128xf32, #tpu.memory_space<vmem>> -> memref<1x128xf32, #tpu.memory_space<vmem>>
    %155 = tpu.memref_slice %arg5[%c10_i32_114] : memref<16x!tpu.dma_semaphore, #tpu.memory_space<semaphore_mem>> -> memref<1x!tpu.dma_semaphore, #tpu.memory_space<semaphore_mem>>
    %156 = tpu.memref_squeeze %155 : memref<1x!tpu.dma_semaphore, #tpu.memory_space<semaphore_mem>> -> memref<!tpu.dma_semaphore, #tpu.memory_space<semaphore_mem>>
    tpu.wait_dma2 semaphore(%156 : memref<!tpu.dma_semaphore, #tpu.memory_space<semaphore_mem>>) src(%153 : memref<1x128xf32, #tpu.memory_space<any>>) dst(%154 : memref<1x128xf32, #tpu.memory_space<vmem>>)
    %c11_i32_119 = arith.constant 11 : i32
    %c0_i32_120 = arith.constant 0 : i32
    %c0_i32_121 = arith.constant 0 : i32
    %157 = tpu.memref_slice %arg2[%c0_i32_120, %c0_i32_121] : memref<32x128xf32, #tpu.memory_space<any>> -> memref<1x128xf32, #tpu.memory_space<any>>
    %c11_i32_122 = arith.constant 11 : i32
    %c0_i32_123 = arith.constant 0 : i32
    %158 = tpu.memref_slice %arg4[%c11_i32_122, %c0_i32_123] : memref<16x128xf32, #tpu.memory_space<vmem>> -> memref<1x128xf32, #tpu.memory_space<vmem>>
    %159 = tpu.memref_slice %arg5[%c11_i32_119] : memref<16x!tpu.dma_semaphore, #tpu.memory_space<semaphore_mem>> -> memref<1x!tpu.dma_semaphore, #tpu.memory_space<semaphore_mem>>
    %160 = tpu.memref_squeeze %159 : memref<1x!tpu.dma_semaphore, #tpu.memory_space<semaphore_mem>> -> memref<!tpu.dma_semaphore, #tpu.memory_space<semaphore_mem>>
    tpu.wait_dma2 semaphore(%160 : memref<!tpu.dma_semaphore, #tpu.memory_space<semaphore_mem>>) src(%157 : memref<1x128xf32, #tpu.memory_space<any>>) dst(%158 : memref<1x128xf32, #tpu.memory_space<vmem>>)
    %c12_i32_124 = arith.constant 12 : i32
    %c0_i32_125 = arith.constant 0 : i32
    %c0_i32_126 = arith.constant 0 : i32
    %161 = tpu.memref_slice %arg2[%c0_i32_125, %c0_i32_126] : memref<32x128xf32, #tpu.memory_space<any>> -> memref<1x128xf32, #tpu.memory_space<any>>
    %c12_i32_127 = arith.constant 12 : i32
    %c0_i32_128 = arith.constant 0 : i32
    %162 = tpu.memref_slice %arg4[%c12_i32_127, %c0_i32_128] : memref<16x128xf32, #tpu.memory_space<vmem>> -> memref<1x128xf32, #tpu.memory_space<vmem>>
    %163 = tpu.memref_slice %arg5[%c12_i32_124] : memref<16x!tpu.dma_semaphore, #tpu.memory_space<semaphore_mem>> -> memref<1x!tpu.dma_semaphore, #tpu.memory_space<semaphore_mem>>
    %164 = tpu.memref_squeeze %163 : memref<1x!tpu.dma_semaphore, #tpu.memory_space<semaphore_mem>> -> memref<!tpu.dma_semaphore, #tpu.memory_space<semaphore_mem>>
    tpu.wait_dma2 semaphore(%164 : memref<!tpu.dma_semaphore, #tpu.memory_space<semaphore_mem>>) src(%161 : memref<1x128xf32, #tpu.memory_space<any>>) dst(%162 : memref<1x128xf32, #tpu.memory_space<vmem>>)
    %c13_i32_129 = arith.constant 13 : i32
    %c0_i32_130 = arith.constant 0 : i32
    %c0_i32_131 = arith.constant 0 : i32
    %165 = tpu.memref_slice %arg2[%c0_i32_130, %c0_i32_131] : memref<32x128xf32, #tpu.memory_space<any>> -> memref<1x128xf32, #tpu.memory_space<any>>
    %c13_i32_132 = arith.constant 13 : i32
    %c0_i32_133 = arith.constant 0 : i32
    %166 = tpu.memref_slice %arg4[%c13_i32_132, %c0_i32_133] : memref<16x128xf32, #tpu.memory_space<vmem>> -> memref<1x128xf32, #tpu.memory_space<vmem>>
    %167 = tpu.memref_slice %arg5[%c13_i32_129] : memref<16x!tpu.dma_semaphore, #tpu.memory_space<semaphore_mem>> -> memref<1x!tpu.dma_semaphore, #tpu.memory_space<semaphore_mem>>
    %168 = tpu.memref_squeeze %167 : memref<1x!tpu.dma_semaphore, #tpu.memory_space<semaphore_mem>> -> memref<!tpu.dma_semaphore, #tpu.memory_space<semaphore_mem>>
    tpu.wait_dma2 semaphore(%168 : memref<!tpu.dma_semaphore, #tpu.memory_space<semaphore_mem>>) src(%165 : memref<1x128xf32, #tpu.memory_space<any>>) dst(%166 : memref<1x128xf32, #tpu.memory_space<vmem>>)
    %c14_i32_134 = arith.constant 14 : i32
    %c0_i32_135 = arith.constant 0 : i32
    %c0_i32_136 = arith.constant 0 : i32
    %169 = tpu.memref_slice %arg2[%c0_i32_135, %c0_i32_136] : memref<32x128xf32, #tpu.memory_space<any>> -> memref<1x128xf32, #tpu.memory_space<any>>
    %c14_i32_137 = arith.constant 14 : i32
    %c0_i32_138 = arith.constant 0 : i32
    %170 = tpu.memref_slice %arg4[%c14_i32_137, %c0_i32_138] : memref<16x128xf32, #tpu.memory_space<vmem>> -> memref<1x128xf32, #tpu.memory_space<vmem>>
    %171 = tpu.memref_slice %arg5[%c14_i32_134] : memref<16x!tpu.dma_semaphore, #tpu.memory_space<semaphore_mem>> -> memref<1x!tpu.dma_semaphore, #tpu.memory_space<semaphore_mem>>
    %172 = tpu.memref_squeeze %171 : memref<1x!tpu.dma_semaphore, #tpu.memory_space<semaphore_mem>> -> memref<!tpu.dma_semaphore, #tpu.memory_space<semaphore_mem>>
    tpu.wait_dma2 semaphore(%172 : memref<!tpu.dma_semaphore, #tpu.memory_space<semaphore_mem>>) src(%169 : memref<1x128xf32, #tpu.memory_space<any>>) dst(%170 : memref<1x128xf32, #tpu.memory_space<vmem>>)
    %c15_i32_139 = arith.constant 15 : i32
    %c0_i32_140 = arith.constant 0 : i32
    %c0_i32_141 = arith.constant 0 : i32
    %173 = tpu.memref_slice %arg2[%c0_i32_140, %c0_i32_141] : memref<32x128xf32, #tpu.memory_space<any>> -> memref<1x128xf32, #tpu.memory_space<any>>
    %c15_i32_142 = arith.constant 15 : i32
    %c0_i32_143 = arith.constant 0 : i32
    %174 = tpu.memref_slice %arg4[%c15_i32_142, %c0_i32_143] : memref<16x128xf32, #tpu.memory_space<vmem>> -> memref<1x128xf32, #tpu.memory_space<vmem>>
    %175 = tpu.memref_slice %arg5[%c15_i32_139] : memref<16x!tpu.dma_semaphore, #tpu.memory_space<semaphore_mem>> -> memref<1x!tpu.dma_semaphore, #tpu.memory_space<semaphore_mem>>
    %176 = tpu.memref_squeeze %175 : memref<1x!tpu.dma_semaphore, #tpu.memory_space<semaphore_mem>> -> memref<!tpu.dma_semaphore, #tpu.memory_space<semaphore_mem>>
    tpu.wait_dma2 semaphore(%176 : memref<!tpu.dma_semaphore, #tpu.memory_space<semaphore_mem>>) src(%173 : memref<1x128xf32, #tpu.memory_space<any>>) dst(%174 : memref<1x128xf32, #tpu.memory_space<vmem>>)
    %c0 = arith.constant 0 : index
    %c0_144 = arith.constant 0 : index
    %177 = vector.load %arg4[%c0, %c0_144] : memref<16x128xf32, #tpu.memory_space<vmem>>, vector<16x128xf32>
    %cst = arith.constant 11.3137083 : f32
    %178 = vector.broadcast %cst : f32 to vector<16x128xf32>
    %179 = arith.mulf %177, %178 : vector<16x128xf32>
    %c0_145 = arith.constant 0 : index
    %c0_146 = arith.constant 0 : index
    %180 = vector.load %arg3[%c0_145, %c0_146] : memref<16x128xf32, #tpu.memory_space<vmem>>, vector<16x128xf32>
    tpu.vector_store %arg3[%c0_145, %c0_146], %179 {strides = array<i32>} : memref<16x128xf32, #tpu.memory_space<vmem>>, vector<16x128xf32>,
    return
  }
  func.func @transform_1(%arg0: i32, %arg1: memref<16xi32, #tpu.memory_space<smem>>) -> (i32, i32) {
    %c0_i32 = arith.constant 0 : i32
    %c0_i32_0 = arith.constant 0 : i32
    return %arg0, %c0_i32 : i32, i32
  }
}

</mosaic_0001>

<bundles_post_ra>
// kernel: tpu_custom_call.1
= control target key start
LH: loop header
LB: loop body
LE: loop exit
PB: predicated region body
PF: predicated region fallthrough
CT: control target
= control target key end

     0   :  { %s1321_s0 = inlined_call_operand.hbm [shape: s32[16], index: 0, kind: input, shape index: {}]   ;;  %s1322_s1 = inlined_call_operand.hbm [shape: f32[32,128], index: 1, kind: input, shape index: {}]   ;;  %s1323_s2 = inlined_call_operand.hbm [shape: f32[16,128], index: 2, kind: output, shape index: {}]  }
   0x1   :  { %s547_s11 = scalar_lea.hbm %s1321_s0, 16 }
   0x2   :  { %p548_p0 = scmp.ne.s32.totalorder %s1321_s0, %s547_s11  ;;  %p551_p1 = scmp.lt.u32.totalorder %s547_s11, %s1321_s0 }
   0x4   :  { %p553_p2 = pnand %p551_p1, %p548_p0 }
   0x6   :  { %556 = shalt.err (!%p553_p2)  }
   0x7   :  { %s999_s16 = smov [#allocation5]  }
   0x8   :  { %8 = dma.hbm_to_smem %s1321_s0, 16, %s999_s16, [#allocation4] }
   0x9   :  { %963 = dma.done.wait [#allocation4], 16 }
   0xa   :  { %964 = vsyncadd [#allocation4], 4294967280 }
   0xb   :  { %10 = sfence }
   0xc   :  { %11 = vsyncpa [#allocation7], 0  ;;  %s13_s19 = sld [smem:[#allocation5]]  ;;  %s1000_s20 = smov [#allocation2]  }
   0xd   :  { %s23_s21 = sshll.u32 %s1000_s20, 4  ;;  %s1046_s22 = sld [smem:[#allocation5 + $0x1]]  ;;  %s1048_s21 = int_to_ptr.vmem [resolvable:$true] %s23_s21 }
   0xe   :  { %s1001_s23 = smov [#allocation2 + $0x1]   ;;  %s1050_s25 = sld [smem:[#allocation5 + $0x2]] }
   0xf   :  { %s40_s24 = sshll.u32 %s1001_s23, 4  ;;  %s1002_s26 = smov [#allocation2 + $0x2]   ;;  %s1052_s24 = int_to_ptr.vmem [resolvable:$true] %s40_s24 }
  0x10   :  { %s57_s0 = sshll.u32 %s1002_s26, 4  ;;  %s1054_s27 = sld [smem:[#allocation5 + $0x3]]  ;;  %s1056_s0 = int_to_ptr.vmem [resolvable:$true] %s57_s0 }
  0x11   :  { %s1065_s8 = scalar_lea.hbm %s1322_s1, 512 }
  0x12   :  { %s480_s28 = sshll.u32 %s13_s19, 4 }
  0x13   :  { %s15_s3 = scalar_lea.hbm %s1322_s1, %s480_s28  ;;  %s482_s4 = sshll.u32 %s1046_s22, 4 }
  0x14   :  { %s557_s5 = scalar_lea.hbm %s15_s3, 16  ;;  %p560_p4 = scmp.lt.u32.totalorder %s15_s3, %s1322_s1 }
  0x15   :  { %p558_p3 = scmp.ne.s32.totalorder %s15_s3, %s557_s5  ;;  %p561_p5 = scmp.lt.u32.totalorder %s1065_s8, %s557_s5 }
  0x16   :  { %p563_p7 = scmp.lt.u32.totalorder %s557_s5, %s15_s3 }
  0x17   :  { %p562_p6 = por %p561_p5, %p560_p4 }
  0x19   :  { %p564_p8 = por %p563_p7, %p562_p6 }
  0x1b   :  { %p565_p9 = pnand %p564_p8, %p558_p3 }
  0x1d   :  { %568 = shalt.err (!%p565_p9)  }
  0x1e   :  { %s569_s11 = scalar_lea.vmem %s1048_s21, 16  ;;  %s1074_s12 = scalar_lea.vmem %s1048_s21, 256 }
  0x1f   :  { %p570_p10 = scmp.ne.s32.totalorder %s1048_s21, %s569_s11  ;;  %p574_p11 = scmp.lt.s32.totalorder %s1048_s21, %s1048_s21 }
  0x20   :  { %p575_p12 = scmp.lt.s32.totalorder %s1074_s12, %s569_s11 }
  0x22   :  { %p576_p13 = por %p575_p12, %p574_p11 }
  0x24   :  { %p577_p0 = pnand %p576_p13, %p570_p10 }
  0x26   :  { %580 = shalt.err (!%p577_p0)  }
  0x27   :  { %26 = dma.hbm_to_vmem [thread:$0]  %s15_s3, 16, %s1048_s21, [#allocation3] }
  0x28   :  { %s30_s15 = scalar_lea.hbm %s1322_s1, %s482_s4  ;;  %s484_s16 = sshll.u32 %s1050_s25, 4 }
  0x29   :  { %s581_s17 = scalar_lea.hbm %s30_s15, 16  ;;  %p584_p2 = scmp.lt.u32.totalorder %s30_s15, %s1322_s1 }
  0x2a   :  { %p582_p1 = scmp.ne.s32.totalorder %s30_s15, %s581_s17  ;;  %p585_p3 = scmp.lt.u32.totalorder %s1065_s8, %s581_s17 }
  0x2b   :  { %p587_p5 = scmp.lt.u32.totalorder %s581_s17, %s30_s15 }
  0x2c   :  { %p586_p4 = por %p585_p3, %p584_p2 }
  0x2e   :  { %p588_p6 = por %p587_p5, %p586_p4 }
  0x30   :  { %p589_p7 = pnand %p588_p6, %p582_p1 }
  0x32   :  { %592 = shalt.err (!%p589_p7)  }
  0x33   :  { %s593_s20 = scalar_lea.vmem %s1052_s24, 16  ;;  %p598_p9 = scmp.lt.s32.totalorder %s1052_s24, %s1048_s21 }
  0x34   :  { %p594_p8 = scmp.ne.s32.totalorder %s1052_s24, %s593_s20  ;;  %p599_p10 = scmp.lt.s32.totalorder %s1074_s12, %s593_s20 }
  0x36   :  { %p600_p11 = por %p599_p10, %p598_p9 }
  0x38   :  { %p601_p12 = pnand %p600_p11, %p594_p8 }
  0x3a   :  { %604 = shalt.err (!%p601_p12)  }
  0x3b   :  { %43 = dma.hbm_to_vmem [thread:$0]  %s30_s15, 16, %s1052_s24, [#allocation3 + $0x1] }
  0x3c   :  { %s47_s25 = scalar_lea.hbm %s1322_s1, %s484_s16  ;;  %s486_s26 = sshll.u32 %s1054_s27, 4 }
  0x3d   :  { %s605_s28 = scalar_lea.hbm %s47_s25, 16  ;;  %p608_p0 = scmp.lt.u32.totalorder %s47_s25, %s1322_s1 }
  0x3e   :  { %p606_p13 = scmp.ne.s32.totalorder %s47_s25, %s605_s28  ;;  %p609_p1 = scmp.lt.u32.totalorder %s1065_s8, %s605_s28 }
  0x3f   :  { %p611_p3 = scmp.lt.u32.totalorder %s605_s28, %s47_s25 }
  0x40   :  { %p610_p2 = por %p609_p1, %p608_p0 }
  0x42   :  { %p612_p4 = por %p611_p3, %p610_p2 }
  0x44   :  { %p613_p5 = pnand %p612_p4, %p606_p13 }
  0x46   :  { %616 = shalt.err (!%p613_p5)  }
  0x47   :  { %s617_s24 = scalar_lea.vmem %s1056_s0, 16  ;;  %p622_p7 = scmp.lt.s32.totalorder %s1056_s0, %s1048_s21 }
  0x48   :  { %p618_p6 = scmp.ne.s32.totalorder %s1056_s0, %s617_s24  ;;  %p623_p8 = scmp.lt.s32.totalorder %s1074_s12, %s617_s24 }
  0x4a   :  { %p624_p9 = por %p623_p8, %p622_p7 }
  0x4c   :  { %p625_p10 = pnand %p624_p9, %p618_p6 }
  0x4e   :  { %628 = shalt.err (!%p625_p10)  }
  0x4f   :  { %60 = dma.hbm_to_vmem [thread:$0]  %s47_s25, 16, %s1056_s0, [#allocation3 + $0x2] }
  0x50   :  { %s64_s4 = scalar_lea.hbm %s1322_s1, %s486_s26  ;;  %s1003_s5 = smov [#allocation2 + $0x3]  }
  0x51   :  { %s74_s6 = sshll.u32 %s1003_s5, 4  ;;  %s1111_s7 = sld [smem:[#allocation5 + $0x4]]  ;;  %s75_s6 = int_to_ptr.vmem [resolvable:$true] %s74_s6 }
  0x52   :  { %s629_s9 = scalar_lea.hbm %s64_s4, 16  ;;  %p632_p12 = scmp.lt.u32.totalorder %s64_s4, %s1322_s1 }
  0x53   :  { %p630_p11 = scmp.ne.s32.totalorder %s64_s4, %s629_s9  ;;  %p633_p13 = scmp.lt.u32.totalorder %s1065_s8, %s629_s9 }
  0x54   :  { %p635_p1 = scmp.lt.u32.totalorder %s629_s9, %s64_s4 }
  0x55   :  { %p634_p0 = por %p633_p13, %p632_p12 }
  0x57   :  { %p636_p2 = por %p635_p1, %p634_p0 }
  0x59   :  { %p637_p3 = pnand %p636_p2, %p630_p11 }
  0x5b   :  { %640 = shalt.err (!%p637_p3)  }
  0x5c   :  { %s641_s0 = scalar_lea.vmem %s75_s6, 16  ;;  %p646_p5 = scmp.lt.s32.totalorder %s75_s6, %s1048_s21 }
  0x5d   :  { %p642_p4 = scmp.ne.s32.totalorder %s75_s6, %s641_s0  ;;  %p647_p6 = scmp.lt.s32.totalorder %s1074_s12, %s641_s0 }
  0x5f   :  { %p648_p7 = por %p647_p6, %p646_p5 }
  0x61   :  { %p649_p8 = pnand %p648_p7, %p642_p4 }
  0x63   :  { %652 = shalt.err (!%p649_p8)  }
  0x64   :  { %77 = dma.hbm_to_vmem [thread:$0]  %s64_s4, 16, %s75_s6, [#allocation3 + $0x3] }
  0x65   :  { %s1004_s13 = smov [#allocation2 + $0x4]   ;;  %s1119_s15 = sld [smem:[#allocation5 + $0x5]] }
  0x66   :  { %s91_s14 = sshll.u32 %s1004_s13, 4  ;;  %s1005_s16 = smov [#allocation2 + $0x5]   ;;  %s92_s14 = int_to_ptr.vmem [resolvable:$true] %s91_s14 }
  0x67   :  { %s108_s17 = sshll.u32 %s1005_s16, 4  ;;  %s1121_s18 = sld [smem:[#allocation5 + $0x6]]  ;;  %s1124_s17 = int_to_ptr.vmem [resolvable:$true] %s108_s17 }
  0x68   :  { %s488_s19 = sshll.u32 %s1111_s7, 4 }
  0x69   :  { %s81_s23 = scalar_lea.hbm %s1322_s1, %s488_s19 }
  0x6a   :  { %s653_s25 = scalar_lea.hbm %s81_s23, 16  ;;  %p656_p10 = scmp.lt.u32.totalorder %s81_s23, %s1322_s1 }
  0x6b   :  { %p654_p9 = scmp.ne.s32.totalorder %s81_s23, %s653_s25  ;;  %p657_p11 = scmp.lt.u32.totalorder %s1065_s8, %s653_s25 }
  0x6c   :  { %p659_p13 = scmp.lt.u32.totalorder %s653_s25, %s81_s23 }
  0x6d   :  { %p658_p12 = por %p657_p11, %p656_p10 }
  0x6f   :  { %p660_p0 = por %p659_p13, %p658_p12 }
  0x71   :  { %p661_p1 = pnand %p660_p0, %p654_p9 }
  0x73   :  { %664 = shalt.err (!%p661_p1)  }
  0x74   :  { %s665_s29 = scalar_lea.vmem %s92_s14, 16  ;;  %p670_p3 = scmp.lt.s32.totalorder %s92_s14, %s1048_s21 }
  0x75   :  { %p666_p2 = scmp.ne.s32.totalorder %s92_s14, %s665_s29  ;;  %p671_p4 = scmp.lt.s32.totalorder %s1074_s12, %s665_s29 }
  0x77   :  { %p672_p5 = por %p671_p4, %p670_p3 }
  0x79   :  { %p673_p6 = pnand %p672_p5, %p666_p2 }
  0x7b   :  { %676 = shalt.err (!%p673_p6)  }
  0x7c   :  { %94 = dma.hbm_to_vmem [thread:$0]  %s81_s23, 16, %s92_s14, [#allocation3 + $0x4] }
  0x7d   :  { %s490_s30 = sshll.u32 %s1119_s15, 4  ;;  %s1006_s24 = smov [#allocation2 + $0x6]  }
  0x7e   :  { %s125_s27 = sshll.u32 %s1006_s24, 4  ;;  %s98_s5 = scalar_lea.hbm %s1322_s1, %s490_s30  ;;  %s1139_s27 = int_to_ptr.vmem [resolvable:$true] %s125_s27 }
  0x7f   :  { %s677_s6 = scalar_lea.hbm %s98_s5, 16  ;;  %p680_p8 = scmp.lt.u32.totalorder %s98_s5, %s1322_s1 }
  0x80   :  { %p678_p7 = scmp.ne.s32.totalorder %s98_s5, %s677_s6  ;;  %p681_p9 = scmp.lt.u32.totalorder %s1065_s8, %s677_s6 }
  0x81   :  { %p683_p11 = scmp.lt.u32.totalorder %s677_s6, %s98_s5 }
  0x82   :  { %p682_p10 = por %p681_p9, %p680_p8 }
  0x84   :  { %p684_p12 = por %p683_p11, %p682_p10 }
  0x86   :  { %p685_p13 = pnand %p684_p12, %p678_p7 }
  0x88   :  { %688 = shalt.err (!%p685_p13)  }
  0x89   :  { %s689_s10 = scalar_lea.vmem %s1124_s17, 16  ;;  %p694_p1 = scmp.lt.s32.totalorder %s1124_s17, %s1048_s21 }
  0x8a   :  { %p690_p0 = scmp.ne.s32.totalorder %s1124_s17, %s689_s10  ;;  %p695_p2 = scmp.lt.s32.totalorder %s1074_s12, %s689_s10 }
  0x8c   :  { %p696_p3 = por %p695_p2, %p694_p1 }
  0x8e   :  { %p697_p4 = pnand %p696_p3, %p690_p0 }
  0x90   :  { %700 = shalt.err (!%p697_p4)  }
  0x91   :  { %111 = dma.hbm_to_vmem [thread:$0]  %s98_s5, 16, %s1124_s17, [#allocation3 + $0x5] }
  0x92   :  { %s492_s11 = sshll.u32 %s1121_s18, 4  ;;  %s1152_s0 = sld [smem:[#allocation5 + $0x7]] }
  0x93   :  { %s115_s15 = scalar_lea.hbm %s1322_s1, %s492_s11 }
  0x94   :  { %s701_s16 = scalar_lea.hbm %s115_s15, 16  ;;  %p704_p6 = scmp.lt.u32.totalorder %s115_s15, %s1322_s1 }
  0x95   :  { %p702_p5 = scmp.ne.s32.totalorder %s115_s15, %s701_s16  ;;  %p705_p7 = scmp.lt.u32.totalorder %s1065_s8, %s701_s16 }
  0x96   :  { %p707_p9 = scmp.lt.u32.totalorder %s701_s16, %s115_s15 }
  0x97   :  { %p706_p8 = por %p705_p7, %p704_p6 }
  0x99   :  { %p708_p10 = por %p707_p9, %p706_p8 }
  0x9b   :  { %p709_p11 = pnand %p708_p10, %p702_p5 }
  0x9d   :  { %712 = shalt.err (!%p709_p11)  }
  0x9e   :  { %s713_s17 = scalar_lea.vmem %s1139_s27, 16  ;;  %p718_p13 = scmp.lt.s32.totalorder %s1139_s27, %s1048_s21 }
  0x9f   :  { %p714_p12 = scmp.ne.s32.totalorder %s1139_s27, %s713_s17  ;;  %p719_p0 = scmp.lt.s32.totalorder %s1074_s12, %s713_s17 }
  0xa1   :  { %p720_p1 = por %p719_p0, %p718_p13 }
  0xa3   :  { %p721_p2 = pnand %p720_p1, %p714_p12 }
  0xa5   :  { %724 = shalt.err (!%p721_p2)  }
  0xa6   :  { %128 = dma.hbm_to_vmem [thread:$0]  %s115_s15, 16, %s1139_s27, [#allocation3 + $0x6] }
  0xa7   :  { %s1007_s18 = smov [#allocation2 + $0x7]   ;;  %s1167_s23 = sld [smem:[#allocation5 + $0x8]] }
  0xa8   :  { %s142_s22 = sshll.u32 %s1007_s18, 4  ;;  %s1008_s25 = smov [#allocation2 + $0x8]   ;;  %s143_s22 = int_to_ptr.vmem [resolvable:$true] %s142_s22 }
  0xa9   :  { %s159_s26 = sshll.u32 %s1008_s25, 4  ;;  %s1169_s28 = sld [smem:[#allocation5 + $0x9]]  ;;  %s1172_s26 = int_to_ptr.vmem [resolvable:$true] %s159_s26 }
  0xaa   :  { %s494_s29 = sshll.u32 %s1152_s0, 4 }
  0xab   :  { %s132_s3 = scalar_lea.hbm %s1322_s1, %s494_s29 }
  0xac   :  { %s725_s4 = scalar_lea.hbm %s132_s3, 16  ;;  %p728_p4 = scmp.lt.u32.totalorder %s132_s3, %s1322_s1 }
  0xad   :  { %p726_p3 = scmp.ne.s32.totalorder %s132_s3, %s725_s4  ;;  %p729_p5 = scmp.lt.u32.totalorder %s1065_s8, %s725_s4 }
  0xae   :  { %p731_p7 = scmp.lt.u32.totalorder %s725_s4, %s132_s3 }
  0xaf   :  { %p730_p6 = por %p729_p5, %p728_p4 }
  0xb1   :  { %p732_p8 = por %p731_p7, %p730_p6 }
  0xb3   :  { %p733_p9 = pnand %p732_p8, %p726_p3 }
  0xb5   :  { %736 = shalt.err (!%p733_p9)  }
  0xb6   :  { %s737_s6 = scalar_lea.vmem %s143_s22, 16  ;;  %p742_p11 = scmp.lt.s32.totalorder %s143_s22, %s1048_s21 }
  0xb7   :  { %p738_p10 = scmp.ne.s32.totalorder %s143_s22, %s737_s6  ;;  %p743_p12 = scmp.lt.s32.totalorder %s1074_s12, %s737_s6 }
  0xb9   :  { %p744_p13 = por %p743_p12, %p742_p11 }
  0xbb   :  { %p745_p0 = pnand %p744_p13, %p738_p10 }
  0xbd   :  { %748 = shalt.err (!%p745_p0)  }
  0xbe   :  { %145 = dma.hbm_to_vmem [thread:$0]  %s132_s3, 16, %s143_s22, [#allocation3 + $0x7] }
  0xbf   :  { %s496_s7 = sshll.u32 %s1167_s23, 4  ;;  %s1009_s9 = smov [#allocation2 + $0x9]  }
  0xc0   :  { %s176_s10 = sshll.u32 %s1009_s9, 4  ;;  %s149_s13 = scalar_lea.hbm %s1322_s1, %s496_s7  ;;  %s1187_s10 = int_to_ptr.vmem [resolvable:$true] %s176_s10 }
  0xc1   :  { %s749_s14 = scalar_lea.hbm %s149_s13, 16  ;;  %p752_p2 = scmp.lt.u32.totalorder %s149_s13, %s1322_s1 }
  0xc2   :  { %p750_p1 = scmp.ne.s32.totalorder %s149_s13, %s749_s14  ;;  %p753_p3 = scmp.lt.u32.totalorder %s1065_s8, %s749_s14 }
  0xc3   :  { %p755_p5 = scmp.lt.u32.totalorder %s749_s14, %s149_s13 }
  0xc4   :  { %p754_p4 = por %p753_p3, %p752_p2 }
  0xc6   :  { %p756_p6 = por %p755_p5, %p754_p4 }
  0xc8   :  { %p757_p7 = pnand %p756_p6, %p750_p1 }
  0xca   :  { %760 = shalt.err (!%p757_p7)  }
  0xcb   :  { %s761_s19 = scalar_lea.vmem %s1172_s26, 16  ;;  %p766_p9 = scmp.lt.s32.totalorder %s1172_s26, %s1048_s21 }
  0xcc   :  { %p762_p8 = scmp.ne.s32.totalorder %s1172_s26, %s761_s19  ;;  %p767_p10 = scmp.lt.s32.totalorder %s1074_s12, %s761_s19 }
  0xce   :  { %p768_p11 = por %p767_p10, %p766_p9 }
  0xd0   :  { %p769_p12 = pnand %p768_p11, %p762_p8 }
  0xd2   :  { %772 = shalt.err (!%p769_p12)  }
  0xd3   :  { %162 = dma.hbm_to_vmem [thread:$0]  %s149_s13, 16, %s1172_s26, [#allocation3 + $0x8] }
  0xd4   :  { %s498_s20 = sshll.u32 %s1169_s28, 4  ;;  %s1200_s17 = sld [smem:[#allocation5 + $0xa]] }
  0xd5   :  { %s166_s23 = scalar_lea.hbm %s1322_s1, %s498_s20 }
  0xd6   :  { %s773_s25 = scalar_lea.hbm %s166_s23, 16  ;;  %p776_p0 = scmp.lt.u32.totalorder %s166_s23, %s1322_s1 }
  0xd7   :  { %p774_p13 = scmp.ne.s32.totalorder %s166_s23, %s773_s25  ;;  %p777_p1 = scmp.lt.u32.totalorder %s1065_s8, %s773_s25 }
  0xd8   :  { %p779_p3 = scmp.lt.u32.totalorder %s773_s25, %s166_s23 }
  0xd9   :  { %p778_p2 = por %p777_p1, %p776_p0 }
  0xdb   :  { %p780_p4 = por %p779_p3, %p778_p2 }
  0xdd   :  { %p781_p5 = pnand %p780_p4, %p774_p13 }
  0xdf   :  { %784 = shalt.err (!%p781_p5)  }
  0xe0   :  { %s785_s26 = scalar_lea.vmem %s1187_s10, 16  ;;  %p790_p7 = scmp.lt.s32.totalorder %s1187_s10, %s1048_s21 }
  0xe1   :  { %p786_p6 = scmp.ne.s32.totalorder %s1187_s10, %s785_s26  ;;  %p791_p8 = scmp.lt.s32.totalorder %s1074_s12, %s785_s26 }
  0xe3   :  { %p792_p9 = por %p791_p8, %p790_p7 }
  0xe5   :  { %p793_p10 = pnand %p792_p9, %p786_p6 }
  0xe7   :  { %796 = shalt.err (!%p793_p10)  }
  0xe8   :  { %179 = dma.hbm_to_vmem [thread:$0]  %s166_s23, 16, %s1187_s10, [#allocation3 + $0x9] }
  0xe9   :  { %s1010_s28 = smov [#allocation2 + $0xa]   ;;  %s1215_s3 = sld [smem:[#allocation5 + $0xb]] }
  0xea   :  { %s193_s24 = sshll.u32 %s1010_s28, 4  ;;  %s1011_s4 = smov [#allocation2 + $0xb]   ;;  %s194_s24 = int_to_ptr.vmem [resolvable:$true] %s193_s24 }
  0xeb   :  { %s210_s5 = sshll.u32 %s1011_s4, 4  ;;  %s1217_s27 = sld [smem:[#allocation5 + $0xc]]  ;;  %s1220_s5 = int_to_ptr.vmem [resolvable:$true] %s210_s5 }
  0xec   :  { %s500_s6 = sshll.u32 %s1200_s17, 4 }
  0xed   :  { %s183_s11 = scalar_lea.hbm %s1322_s1, %s500_s6 }
  0xee   :  { %s797_s0 = scalar_lea.hbm %s183_s11, 16  ;;  %p800_p12 = scmp.lt.u32.totalorder %s183_s11, %s1322_s1 }
  0xef   :  { %p798_p11 = scmp.ne.s32.totalorder %s183_s11, %s797_s0  ;;  %p801_p13 = scmp.lt.u32.totalorder %s1065_s8, %s797_s0 }
  0xf0   :  { %p803_p1 = scmp.lt.u32.totalorder %s797_s0, %s183_s11 }
  0xf1   :  { %p802_p0 = por %p801_p13, %p800_p12 }
  0xf3   :  { %p804_p2 = por %p803_p1, %p802_p0 }
  0xf5   :  { %p805_p3 = pnand %p804_p2, %p798_p11 }
  0xf7   :  { %808 = shalt.err (!%p805_p3)  }
  0xf8   :  { %s809_s14 = scalar_lea.vmem %s194_s24, 16  ;;  %p814_p5 = scmp.lt.s32.totalorder %s194_s24, %s1048_s21 }
  0xf9   :  { %p810_p4 = scmp.ne.s32.totalorder %s194_s24, %s809_s14  ;;  %p815_p6 = scmp.lt.s32.totalorder %s1074_s12, %s809_s14 }
  0xfb   :  { %p816_p7 = por %p815_p6, %p814_p5 }
  0xfd   :  { %p817_p8 = pnand %p816_p7, %p810_p4 }
  0xff   :  { %820 = shalt.err (!%p817_p8)  }
 0x100   :  { %196 = dma.hbm_to_vmem [thread:$0]  %s183_s11, 16, %s194_s24, [#allocation3 + $0xa] }
 0x101   :  { %s502_s15 = sshll.u32 %s1215_s3, 4  ;;  %s1012_s16 = smov [#allocation2 + $0xc]  }
 0x102   :  { %s227_s19 = sshll.u32 %s1012_s16, 4  ;;  %s200_s18 = scalar_lea.hbm %s1322_s1, %s502_s15  ;;  %s1235_s19 = int_to_ptr.vmem [resolvable:$true] %s227_s19 }
 0x103   :  { %s821_s22 = scalar_lea.hbm %s200_s18, 16  ;;  %p824_p10 = scmp.lt.u32.totalorder %s200_s18, %s1322_s1 }
 0x104   :  { %p822_p9 = scmp.ne.s32.totalorder %s200_s18, %s821_s22  ;;  %p825_p11 = scmp.lt.u32.totalorder %s1065_s8, %s821_s22 }
 0x105   :  { %p827_p13 = scmp.lt.u32.totalorder %s821_s22, %s200_s18 }
 0x106   :  { %p826_p12 = por %p825_p11, %p824_p10 }
 0x108   :  { %p828_p0 = por %p827_p13, %p826_p12 }
 0x10a   :  { %p829_p1 = pnand %p828_p0, %p822_p9 }
 0x10c   :  { %832 = shalt.err (!%p829_p1)  }
 0x10d   :  { %s833_s29 = scalar_lea.vmem %s1220_s5, 16  ;;  %p838_p3 = scmp.lt.s32.totalorder %s1220_s5, %s1048_s21 }
 0x10e   :  { %p834_p2 = scmp.ne.s32.totalorder %s1220_s5, %s833_s29  ;;  %p839_p4 = scmp.lt.s32.totalorder %s1074_s12, %s833_s29 }
 0x110   :  { %p840_p5 = por %p839_p4, %p838_p3 }
 0x112   :  { %p841_p6 = pnand %p840_p5, %p834_p2 }
 0x114   :  { %844 = shalt.err (!%p841_p6)  }
 0x115   :  { %213 = dma.hbm_to_vmem [thread:$0]  %s200_s18, 16, %s1220_s5, [#allocation3 + $0xb] }
 0x116   :  { %s504_s30 = sshll.u32 %s1217_s27, 4  ;;  %s1248_s26 = sld [smem:[#allocation5 + $0xd]] }
 0x117   :  { %s217_s3 = scalar_lea.hbm %s1322_s1, %s504_s30 }
 0x118   :  { %s845_s4 = scalar_lea.hbm %s217_s3, 16  ;;  %p848_p8 = scmp.lt.u32.totalorder %s217_s3, %s1322_s1 }
 0x119   :  { %p846_p7 = scmp.ne.s32.totalorder %s217_s3, %s845_s4  ;;  %p849_p9 = scmp.lt.u32.totalorder %s1065_s8, %s845_s4 }
 0x11a   :  { %p851_p11 = scmp.lt.u32.totalorder %s845_s4, %s217_s3 }
 0x11b   :  { %p850_p10 = por %p849_p9, %p848_p8 }
 0x11d   :  { %p852_p12 = por %p851_p11, %p850_p10 }
 0x11f   :  { %p853_p13 = pnand %p852_p12, %p846_p7 }
 0x121   :  { %856 = shalt.err (!%p853_p13)  }
 0x122   :  { %s857_s5 = scalar_lea.vmem %s1235_s19, 16  ;;  %p862_p1 = scmp.lt.s32.totalorder %s1235_s19, %s1048_s21 }
 0x123   :  { %p858_p0 = scmp.ne.s32.totalorder %s1235_s19, %s857_s5  ;;  %p863_p2 = scmp.lt.s32.totalorder %s1074_s12, %s857_s5 }
 0x125   :  { %p864_p3 = por %p863_p2, %p862_p1 }
 0x127   :  { %p865_p4 = pnand %p864_p3, %p858_p0 }
 0x129   :  { %868 = shalt.err (!%p865_p4)  }
 0x12a   :  { %230 = dma.hbm_to_vmem [thread:$0]  %s217_s3, 16, %s1235_s19, [#allocation3 + $0xc] }
 0x12b   :  { %s1013_s27 = smov [#allocation2 + $0xd]   ;;  %s1263_s11 = sld [smem:[#allocation5 + $0xe]] }
 0x12c   :  { %s244_s9 = sshll.u32 %s1013_s27, 4  ;;  %s1014_s0 = smov [#allocation2 + $0xe]   ;;  %s245_s9 = int_to_ptr.vmem [resolvable:$true] %s244_s9 }
 0x12d   :  { %s261_s13 = sshll.u32 %s1014_s0, 4  ;;  %s1265_s10 = sld [smem:[#allocation5 + $0xf]]  ;;  %s1268_s13 = int_to_ptr.vmem [resolvable:$true] %s261_s13 }
 0x12e   :  { %s506_s14 = sshll.u32 %s1248_s26, 4 }
 0x12f   :  { %s234_s20 = scalar_lea.hbm %s1322_s1, %s506_s14 }
 0x130   :  { %s869_s17 = scalar_lea.hbm %s234_s20, 16  ;;  %p872_p6 = scmp.lt.u32.totalorder %s234_s20, %s1322_s1 }
 0x131   :  { %p870_p5 = scmp.ne.s32.totalorder %s234_s20, %s869_s17  ;;  %p873_p7 = scmp.lt.u32.totalorder %s1065_s8, %s869_s17 }
 0x132   :  { %p875_p9 = scmp.lt.u32.totalorder %s869_s17, %s234_s20 }
 0x133   :  { %p874_p8 = por %p873_p7, %p872_p6 }
 0x135   :  { %p876_p10 = por %p875_p9, %p874_p8 }
 0x137   :  { %p877_p11 = pnand %p876_p10, %p870_p5 }
 0x139   :  { %880 = shalt.err (!%p877_p11)  }
 0x13a   :  { %s881_s22 = scalar_lea.vmem %s245_s9, 16  ;;  %p886_p13 = scmp.lt.s32.totalorder %s245_s9, %s1048_s21 }
 0x13b   :  { %p882_p12 = scmp.ne.s32.totalorder %s245_s9, %s881_s22  ;;  %p887_p0 = scmp.lt.s32.totalorder %s1074_s12, %s881_s22 }
 0x13d   :  { %p888_p1 = por %p887_p0, %p886_p13 }
 0x13f   :  { %p889_p2 = pnand %p888_p1, %p882_p12 }
 0x141   :  { %892 = shalt.err (!%p889_p2)  }
 0x142   :  { %247 = dma.hbm_to_vmem [thread:$0]  %s234_s20, 16, %s245_s9, [#allocation3 + $0xd] }
 0x143   :  { %s508_s23 = sshll.u32 %s1263_s11, 4  ;;  %s1015_s25 = smov [#allocation2 + $0xf]  }
 0x144   :  { %s278_s29 = sshll.u32 %s1015_s25, 4  ;;  %s251_s28 = scalar_lea.hbm %s1322_s1, %s508_s23  ;;  %s1283_s29 = int_to_ptr.vmem [resolvable:$true] %s278_s29 }
 0x145   :  { %s893_s24 = scalar_lea.hbm %s251_s28, 16  ;;  %p896_p4 = scmp.lt.u32.totalorder %s251_s28, %s1322_s1 }
 0x146   :  { %p894_p3 = scmp.ne.s32.totalorder %s251_s28, %s893_s24  ;;  %p897_p5 = scmp.lt.u32.totalorder %s1065_s8, %s893_s24 }
 0x147   :  { %p899_p7 = scmp.lt.u32.totalorder %s893_s24, %s251_s28 }
 0x148   :  { %p898_p6 = por %p897_p5, %p896_p4 }
 0x14a   :  { %p900_p8 = por %p899_p7, %p898_p6 }
 0x14c   :  { %p901_p9 = pnand %p900_p8, %p894_p3 }
 0x14e   :  { %904 = shalt.err (!%p901_p9)  }
 0x14f   :  { %s905_s6 = scalar_lea.vmem %s1268_s13, 16  ;;  %p910_p11 = scmp.lt.s32.totalorder %s1268_s13, %s1048_s21 }
 0x150   :  { %p906_p10 = scmp.ne.s32.totalorder %s1268_s13, %s905_s6  ;;  %p911_p12 = scmp.lt.s32.totalorder %s1074_s12, %s905_s6 }
 0x152   :  { %p912_p13 = por %p911_p12, %p910_p11 }
 0x154   :  { %p913_p0 = pnand %p912_p13, %p906_p10 }
 0x156   :  { %916 = shalt.err (!%p913_p0)  }
 0x157   :  { %264 = dma.hbm_to_vmem [thread:$0]  %s251_s28, 16, %s1268_s13, [#allocation3 + $0xe] }
 0x158   :  { %s510_s7 = sshll.u32 %s1265_s10, 4 }
 0x159   :  { %s268_s9 = scalar_lea.hbm %s1322_s1, %s510_s7 }
 0x15a   :  { %s917_s11 = scalar_lea.hbm %s268_s9, 16  ;;  %p920_p2 = scmp.lt.u32.totalorder %s268_s9, %s1322_s1 }
 0x15b   :  { %p918_p1 = scmp.ne.s32.totalorder %s268_s9, %s917_s11  ;;  %p921_p3 = scmp.lt.u32.totalorder %s1065_s8, %s917_s11 }
 0x15c   :  { %p923_p5 = scmp.lt.u32.totalorder %s917_s11, %s268_s9 }
 0x15d   :  { %p922_p4 = por %p921_p3, %p920_p2 }
 0x15f   :  { %p924_p6 = por %p923_p5, %p922_p4 }
 0x161   :  { %p925_p7 = pnand %p924_p6, %p918_p1 }
 0x163   :  { %928 = shalt.err (!%p925_p7)  }
 0x164   :  { %s929_s13 = scalar_lea.vmem %s1283_s29, 16  ;;  %p934_p9 = scmp.lt.s32.totalorder %s1283_s29, %s1048_s21 }
 0x165   :  { %p930_p8 = scmp.ne.s32.totalorder %s1283_s29, %s929_s13  ;;  %p935_p10 = scmp.lt.s32.totalorder %s1074_s12, %s929_s13 }
 0x167   :  { %p936_p11 = por %p935_p10, %p934_p9 }
 0x169   :  { %p937_p12 = pnand %p936_p11, %p930_p8 }
 0x16b   :  { %940 = shalt.err (!%p937_p12)  }
 0x16c   :  { %281 = dma.hbm_to_vmem [thread:$0]  %s268_s9, 16, %s1283_s29, [#allocation3 + $0xf] }
 0x16d   :  { %965 = dma.done.wait [#allocation3], 16 }
 0x16e   :  { %966 = vsyncadd [#allocation3], 4294967280 }
 0x16f   :  { %967 = dma.done.wait [#allocation3 + $0x1], 16 }
 0x170   :  { %968 = vsyncadd [#allocation3 + $0x1], 4294967280 }
 0x171   :  { %969 = dma.done.wait [#allocation3 + $0x2], 16 }
 0x172   :  { %970 = vsyncadd [#allocation3 + $0x2], 4294967280 }
 0x173   :  { %971 = dma.done.wait [#allocation3 + $0x3], 16 }
 0x174   :  { %972 = vsyncadd [#allocation3 + $0x3], 4294967280 }
 0x175   :  { %973 = dma.done.wait [#allocation3 + $0x4], 16 }
 0x176   :  { %974 = vsyncadd [#allocation3 + $0x4], 4294967280 }
 0x177   :  { %975 = dma.done.wait [#allocation3 + $0x5], 16 }
 0x178   :  { %976 = vsyncadd [#allocation3 + $0x5], 4294967280 }
 0x179   :  { %977 = dma.done.wait [#allocation3 + $0x6], 16 }
 0x17a   :  { %978 = vsyncadd [#allocation3 + $0x6], 4294967280 }
 0x17b   :  { %979 = dma.done.wait [#allocation3 + $0x7], 16 }
 0x17c   :  { %980 = vsyncadd [#allocation3 + $0x7], 4294967280 }
 0x17d   :  { %981 = dma.done.wait [#allocation3 + $0x8], 16 }
 0x17e   :  { %982 = vsyncadd [#allocation3 + $0x8], 4294967280 }
 0x17f   :  { %983 = dma.done.wait [#allocation3 + $0x9], 16 }
 0x180   :  { %984 = vsyncadd [#allocation3 + $0x9], 4294967280 }
 0x181   :  { %985 = dma.done.wait [#allocation3 + $0xa], 16 }
 0x182   :  { %986 = vsyncadd [#allocation3 + $0xa], 4294967280 }
 0x183   :  { %987 = dma.done.wait [#allocation3 + $0xb], 16 }
 0x184   :  { %988 = vsyncadd [#allocation3 + $0xb], 4294967280 }
 0x185   :  { %989 = dma.done.wait [#allocation3 + $0xc], 16 }
 0x186   :  { %990 = vsyncadd [#allocation3 + $0xc], 4294967280 }
 0x187   :  { %991 = dma.done.wait [#allocation3 + $0xd], 16 }
 0x188   :  { %992 = vsyncadd [#allocation3 + $0xd], 4294967280 }
 0x189   :  { %993 = dma.done.wait [#allocation3 + $0xe], 16 }
 0x18a   :  { %994 = vsyncadd [#allocation3 + $0xe], 4294967280 }
 0x18b   :  { %995 = dma.done.wait [#allocation3 + $0xf], 16 }
 0x18c   :  { %996 = vsyncadd [#allocation3 + $0xf], 4294967280  ;;  %s1016_s1 = smov [#allocation6]   ;;  %v315_v0 = vld [vmem:[#allocation2] sm:$0xff]  ;;  %v316_v1 = vld [vmem:[#allocation2 + $0x8] sm:$0xff] }
 0x18d   :  { %s326_s21 = sshll.u32 %s1016_s1, 4  ;;  %v317_v2 = vmul.f32 11.313708, %v315_v0  ;;  %v318_v3 = vmul.f32 11.313708, %v316_v1  ;;  %s327_s21 = int_to_ptr.vmem [resolvable:$true] %s326_s21 }
 0x18e   :  { %s941_s8 = scalar_lea.vmem %s327_s21, 256  ;;  %p946_p0 = scmp.lt.s32.totalorder %s327_s21, %s327_s21 }
 0x18f   :  { %319 = vst [vmem:[#allocation6] sm:$0xff] %v317_v2  ;;  %320 = vst [vmem:[#allocation6 + $0x8] sm:$0xff] %v318_v3  ;;  %p942_p13 = scmp.ne.s32.totalorder %s327_s21, %s941_s8  ;;  %p947_p1 = scmp.lt.s32.totalorder %s941_s8, %s941_s8 }
 0x191   :  { %p948_p2 = por %p947_p1, %p946_p0 }
 0x193   :  { %p949_p3 = pnand %p948_p2, %p942_p13 }
 0x195   :  { %952 = shalt.err (!%p949_p3)
}
 0x196   :  { %s953_s15 = scalar_lea.hbm %s1323_s2, 256 }
 0x197   :  { %p954_p4 = scmp.ne.s32.totalorder %s1323_s2, %s953_s15  ;;  %p957_p5 = scmp.lt.u32.totalorder %s953_s15, %s1323_s2 }
 0x199   :  { %p959_p6 = pnand %p957_p5, %p954_p4 }
 0x19b   :  { %962 = shalt.err (!%p959_p6)
}
 0x19c   :  { %s1017_s19 = smov 128   ;;  %s1018_s22 = smov 8  }
 0x19d   :  { %332 = dma.vmem_to_hbm [thread:$0]  %s327_s21, 256, %s1323_s2, [#allocation7], %s1017_s19, %s1017_s19, %s1018_s22  }
 0x19e   :  { %997 = dma.done.wait [#allocation7], 256  }
 0x19f   :  { %998 = vsyncadd [#allocation7], 4294967040 }
 0x1a0   :  { %336 = vsyncpa [#allocation7], 1 }
 0x1a1   :  { %337 = vsyncmov [#allocation3] }
 0x1a4   :  { %s338_s29 = vpop.sfrf %337 }
 0x1a5   :  { %p511_p7 = scmp.ne.s32.totalorder %s338_s29, 0 }
 0x1a7   :  { %342 = shalt.err (%p511_p7)  }
 0x1a8   :  { %344 = vsyncmov [#allocation3 + $0x1] }
 0x1ab   :  { %s345_s30 = vpop.sfrf %344 }
 0x1ac   :  { %p512_p8 = scmp.ne.s32.totalorder %s345_s30, 0 }
 0x1ae   :  { %349 = shalt.err (%p512_p8)  }
 0x1af   :  { %351 = vsyncmov [#allocation3 + $0x2] }
 0x1b2   :  { %s352_s26 = vpop.sfrf %351 }
 0x1b3   :  { %p513_p9 = scmp.ne.s32.totalorder %s352_s26, 0 }
 0x1b5   :  { %356 = shalt.err (%p513_p9)  }
 0x1b6   :  { %358 = vsyncmov [#allocation3 + $0x3] }
 0x1b9   :  { %s359_s28 = vpop.sfrf %358 }
 0x1ba   :  { %p514_p10 = scmp.ne.s32.totalorder %s359_s28, 0 }
 0x1bc   :  { %363 = shalt.err (%p514_p10)  }
 0x1bd   :  { %365 = vsyncmov [#allocation3 + $0x4] }
 0x1c0   :  { %s366_s2 = vpop.sfrf %365 }
 0x1c1   :  { %p515_p11 = scmp.ne.s32.totalorder %s366_s2, 0 }
 0x1c3   :  { %370 = shalt.err (%p515_p11)  }
 0x1c4   :  { %372 = vsyncmov [#allocation3 + $0x5] }
 0x1c7   :  { %s373_s24 = vpop.sfrf %372 }
 0x1c8   :  { %p516_p12 = scmp.ne.s32.totalorder %s373_s24, 0 }
 0x1ca   :  { %377 = shalt.err (%p516_p12)  }
 0x1cb   :  { %379 = vsyncmov [#allocation3 + $0x6] }
 0x1ce   :  { %s380_s3 = vpop.sfrf %379 }
 0x1cf   :  { %p517_p13 = scmp.ne.s32.totalorder %s380_s3, 0 }
 0x1d1   :  { %384 = shalt.err (%p517_p13)  }
 0x1d2   :  { %386 = vsyncmov [#allocation3 + $0x7] }
 0x1d5   :  { %s387_s4 = vpop.sfrf %386 }
 0x1d6   :  { %p518_p0 = scmp.ne.s32.totalorder %s387_s4, 0 }
 0x1d8   :  { %391 = shalt.err (%p518_p0)  }
 0x1d9   :  { %393 = vsyncmov [#allocation3 + $0x8] }
 0x1dc   :  { %s394_s6 = vpop.sfrf %393 }
 0x1dd   :  { %p519_p1 = scmp.ne.s32.totalorder %s394_s6, 0 }
 0x1df   :  { %398 = shalt.err (%p519_p1)  }
 0x1e0   :  { %400 = vsyncmov [#allocation3 + $0x9] }
 0x1e3   :  { %s401_s7 = vpop.sfrf %400 }
 0x1e4   :  { %p520_p2 = scmp.ne.s32.totalorder %s401_s7, 0 }
 0x1e6   :  { %405 = shalt.err (%p520_p2)  }
 0x1e7   :  { %407 = vsyncmov [#allocation3 + $0xa] }
 0x1ea   :  { %s408_s5 = vpop.sfrf %407 }
 0x1eb   :  { %p521_p3 = scmp.ne.s32.totalorder %s408_s5, 0 }
 0x1ed   :  { %412 = shalt.err (%p521_p3)  }
 0x1ee   :  { %414 = vsyncmov [#allocation3 + $0xb] }
 0x1f1   :  { %s415_s27 = vpop.sfrf %414 }
 0x1f2   :  { %p522_p4 = scmp.ne.s32.totalorder %s415_s27, 0 }
 0x1f4   :  { %419 = shalt.err (%p522_p4)  }
 0x1f5   :  { %421 = vsyncmov [#allocation3 + $0xc] }
 0x1f8   :  { %s422_s9 = vpop.sfrf %421 }
 0x1f9   :  { %p523_p5 = scmp.ne.s32.totalorder %s422_s9, 0 }
 0x1fb   :  { %426 = shalt.err (%p523_p5)  }
 0x1fc   :  { %428 = vsyncmov [#allocation3 + $0xd] }
 0x1ff   :  { %s429_s11 = vpop.sfrf %428 }
 0x200   :  { %p524_p6 = scmp.ne.s32.totalorder %s429_s11, 0 }
 0x202   :  { %433 = shalt.err (%p524_p6)  }
 0x203   :  { %435 = vsyncmov [#allocation3 + $0xe] }
 0x206   :  { %s436_s0 = vpop.sfrf %435 }
 0x207   :  { %p525_p7 = scmp.ne.s32.totalorder %s436_s0, 0 }
 0x209   :  { %440 = shalt.err (%p525_p7)  }
 0x20a   :  { %442 = vsyncmov [#allocation3 + $0xf] }
 0x20d   :  { %s443_s14 = vpop.sfrf %442 }
 0x20e   :  { %p526_p8 = scmp.ne.s32.totalorder %s443_s14, 0 }
 0x210   :  { %447 = shalt.err (%p526_p8)  }

</bundles_post_ra>
